<compile_context>
chip_gen: v7x
topology: tpu7x:2x2x1
jax: 0.10.0
libtpu: 0.0.40
codegen_flags: <defaults>
</compile_context>

<pallas_src>
import functools

import jax
import jax.numpy as jnp
from jax.experimental import pallas as pl
from jax.experimental.pallas import tpu as pltpu

EPS = 1e-5           # nn.BatchNorm1d default eps
NEG_SLOPE = 0.01     # nn.LeakyReLU default negative_slope
LANE = 128           # TODO(synk): prefer 256-multiple N/K padding for large dims on v6e/v7x


def _round_up(x, m):
    return ((x + m - 1) // m) * m


def _lt_fused_kernel(x_ref, w1_ref, gamma_ref, beta_ref, w2_ref, b2_ref,
                     wfc_ref, bfc_ref, feats_ref, logits_ref,
                     hsum_acc, hsq_acc, scale_sc, shift_sc, *, inv_b):
    """Two-phase fused kernel.

    phase 0 (grid axis 0 == 0): h = x @ W1; accumulate per-feature sum /
        sum-of-squares over the FULL batch into (8, in_p) VMEM scratch using
        sublane-aligned VPU adds only.  At the last batch tile, do the single
        cross-sublane reduce and fold BN into per-feature scale/shift.
        linear1's bias is omitted: it is exactly cancelled by BN mean
        subtraction.
    phase 1 (grid axis 0 == 1): recompute h, apply folded BN (one FMA),
        LeakyReLU, linear2, fc.  Matmul operands bf16, accumulation f32.
    """
    phase = pl.program_id(0)
    i = pl.program_id(1)
    nb = pl.num_programs(1)

    # Shared by both phases: h = x @ W1  (bf16 operands, f32 MXU accumulation).
    h = jnp.dot(x_ref[...], w1_ref[...], preferred_element_type=jnp.float32)

    @pl.when(phase == 0)
    def _stats():
        @pl.when(i == 0)
        def _():
            hsum_acc[...] = jnp.zeros_like(hsum_acc)
            hsq_acc[...] = jnp.zeros_like(hsq_acc)

        # Per-sublane partial sums: plain (8, in_p) VPU adds (no XLU, no
        # masked (1, N) read-modify-write per tile).  tb is a multiple of 8.
        tb = h.shape[0]
        s = h[0:8, :]
        q = s * s
        for j in range(1, tb // 8):
            hj = h[8 * j:8 * (j + 1), :]
            s = s + hj
            q = q + hj * hj
        hsum_acc[...] += s
        hsq_acc[...] += q

        @pl.when(i == nb - 1)
        def _finalize():
            # One cross-sublane reduce for the whole kernel.
            hsum = jnp.sum(hsum_acc[...], axis=0, keepdims=True)
            hsq = jnp.sum(hsq_acc[...], axis=0, keepdims=True)
            mean = hsum * inv_b                      # padded rows contribute 0
            var = jnp.maximum(hsq * inv_b - mean * mean, 0.0)
            scale = gamma_ref[...] * jax.lax.rsqrt(var + EPS)
            scale_sc[...] = scale
            shift_sc[...] = beta_ref[...] - mean * scale

    @pl.when(phase == 1)
    def _apply():
        hn = h * scale_sc[...] + shift_sc[...]       # folded BatchNorm (one FMA)
        a = jnp.maximum(hn, NEG_SLOPE * hn)          # LeakyReLU (0 < slope < 1)
        feats = jnp.dot(a.astype(jnp.bfloat16), w2_ref[...],
                        preferred_element_type=jnp.float32) + b2_ref[...]
        feats_ref[...] = feats.astype(feats_ref.dtype)
        logits = jnp.dot(feats.astype(jnp.bfloat16), wfc_ref[...],
                         preferred_element_type=jnp.float32) + bfc_ref[...]
        logits_ref[...] = logits.astype(logits_ref.dtype)


def _vmem_estimate(tb, in_p, out_p, nc_p):
    """Rough VMEM budget: single-buffered weights + double-buffered streams."""
    bf, f = 2, 4
    vec = 8  # (1, N) buffers pad to 8 sublanes
    resident = (in_p * in_p + in_p * out_p + out_p * nc_p) * bf          # w1, w2, wfc
    resident += (2 * in_p + out_p + nc_p) * f * vec                      # gamma, beta, b2, bfc
    streamed = 2 * tb * in_p * bf                                        # x (double-buffered)
    outs = 2 * (tb * out_p * bf + tb * nc_p * f)                         # feats bf16 + logits f32
    scratch = (2 * 8 * in_p + 2 * vec * in_p) * f                        # hsum/hsq + scale/shift
    return resident + streamed + outs + scratch


def linear_transform_forward(x, params, *, batch_tile=512):
    """x: (B, in_feats) f32. params: dict of pre-transposed weights/biases
    (nn.Linear weights stored as (in, out), biases/BN params as (1, F))."""
    B, in_feats = x.shape
    out_feats = params["w2"].shape[1]
    num_classes = params["wfc"].shape[1]
    f32, bf16 = jnp.float32, jnp.bfloat16

    # Lane-pad all feature dims to multiples of 128.
    in_p = _round_up(in_feats, LANE)
    out_p = _round_up(out_feats, LANE)
    nc_p = _round_up(num_classes, LANE)

    # Batch tiling: nb = ceil(B / batch_tile) tiles, tb the smallest multiple
    # of 8 covering them -> padding waste < 8 rows per tile (no full-tile pad).
    nb = max(1, -(-B // batch_tile))
    tb = _round_up(-(-B // nb), 8)
    b_p = tb * nb
    assert tb % 8 == 0 and b_p >= B

    def pad2(a, rows, cols, dtype):
        a = a.astype(dtype)
        return jnp.pad(a, ((0, rows - a.shape[0]), (0, cols - a.shape[1])))

    x_p = pad2(x, b_p, in_p, bf16)                    # zero rows/cols: no effect
    w1_p = pad2(params["w1"], in_p, in_p, bf16)
    w2_p = pad2(params["w2"], in_p, out_p, bf16)
    b2_p = pad2(params["b2"], 1, out_p, f32)
    wfc_p = pad2(params["wfc"], out_p, nc_p, bf16)
    bfc_p = pad2(params["bfc"], 1, nc_p, f32)
    gamma_p = pad2(params["gamma"], 1, in_p, f32)
    beta_p = pad2(params["beta"], 1, in_p, f32)

    def resident(shape):
        # Constant index_map + single buffer: stays VMEM-resident, half the
        # footprint of the default 2-deep pipeline buffers.
        return pl.BlockSpec(shape, lambda p, i: (0, 0),
                            pipeline_mode=pl.Buffered(1))

    in_specs = [
        pl.BlockSpec((tb, in_p), lambda p, i: (i, 0)),   # x: streamed per batch tile
        resident((in_p, in_p)),                          # w1
        resident((1, in_p)),                             # gamma
        resident((1, in_p)),                             # beta
        resident((in_p, out_p)),                         # w2
        resident((1, out_p)),                            # b2
        resident((out_p, nc_p)),                         # wfc
        resident((1, nc_p)),                             # bfc
    ]
    # Outputs: pinned to block 0 during phase 0 (never flushed with garbage),
    # one lane-dense write per batch tile during phase 1.
    out_specs = (
        pl.BlockSpec((tb, out_p), lambda p, i: (i * p, 0)),
        pl.BlockSpec((tb, nc_p), lambda p, i: (i * p, 0)),
    )
    scratch_shapes = [
        pltpu.VMEM((8, in_p), f32),   # hsum partials
        pltpu.VMEM((8, in_p), f32),   # hsq partials
        pltpu.VMEM((1, in_p), f32),   # folded BN scale
        pltpu.VMEM((1, in_p), f32),   # folded BN shift
    ]

    est = _vmem_estimate(tb, in_p, out_p, nc_p)
    vmem_limit = min(max(int(1.5 * est) + (4 << 20), 32 << 20), 128 << 20)

    feats_p, logits_p = pl.pallas_call(
        functools.partial(_lt_fused_kernel, inv_b=1.0 / B),
        out_shape=(jax.ShapeDtypeStruct((b_p, out_p), bf16),   # feats stored bf16
                   jax.ShapeDtypeStruct((b_p, nc_p), f32)),
        grid=(2, nb),
        in_specs=in_specs,
        out_specs=out_specs,
        scratch_shapes=scratch_shapes,
        compiler_params=pltpu.CompilerParams(
            dimension_semantics=("arbitrary", "arbitrary"),
            vmem_limit_bytes=vmem_limit),
    )(x_p, w1_p, gamma_p, beta_p, w2_p, b2_p, wfc_p, bfc_p)

    feats = feats_p[:B, :out_feats].astype(f32)
    logits = logits_p[:B, :num_classes]
    return feats, logits


def _reference(x, p):
    """Pure-JAX mirror of the PyTorch forward (train-mode BN, biased batch var).
    Matmul operands cast to bf16 to match the kernel's MXU precision."""
    bf = jnp.bfloat16
    h = jnp.dot(x.astype(bf), p["w1"].astype(bf),
                preferred_element_type=jnp.float32) + p["b1"]
    mean = jnp.mean(h, axis=0, keepdims=True)
    var = jnp.mean((h - mean) ** 2, axis=0, keepdims=True)
    hn = (h - mean) * jax.lax.rsqrt(var + EPS) * p["gamma"] + p["beta"]
    a = jnp.where(hn >= 0, hn, NEG_SLOPE * hn)
    feats = jnp.dot(a.astype(bf), p["w2"].astype(bf),
                    preferred_element_type=jnp.float32) + p["b2"]
    logits = jnp.dot(feats.astype(bf), p["wfc"].astype(bf),
                     preferred_element_type=jnp.float32) + p["bfc"]
    return feats, logits


def _init_params(key, in_feats, out_feats, num_classes):
    ks = jax.random.split(key, 8)

    def u(k, shape, fan_in):
        bound = 1.0 / (fan_in ** 0.5)
        return jax.random.uniform(k, shape, jnp.float32, -bound, bound)

    return {
        # nn.Linear weights are (out, in); stored pre-transposed as (in, out).
        "w1": u(ks[0], (in_feats, in_feats), in_feats),
        "b1": u(ks[1], (1, in_feats), in_feats),   # unused by kernel: cancelled by BN
        "gamma": 1.0 + 0.1 * jax.random.normal(ks[2], (1, in_feats), jnp.float32),
        "beta": 0.1 * jax.random.normal(ks[3], (1, in_feats), jnp.float32),
        "w2": u(ks[4], (in_feats, out_feats), in_feats),
        "b2": u(ks[5], (1, out_feats), in_feats),
        "wfc": u(ks[6], (out_feats, num_classes), out_feats),
        "bfc": u(ks[7], (1, num_classes), out_feats),
    }


if __name__ == "__main__":
    key = jax.random.PRNGKey(0)
    kx, kp = jax.random.split(key)

    # Small but non-trivial: lane padding (96/48/90 -> 128) and both the
    # single-tile (nb=1) and multi-tile BN-stat accumulation paths.
    B, in_feats, out_feats, num_classes = 200, 96, 48, 90
    x = jax.random.normal(kx, (B, in_feats), jnp.float32)
    params = _init_params(kp, in_feats, out_feats, num_classes)

    rf, rl = _reference(x, params)

    # Default (large) batch tile: nb == 1, whole batch fused in one pass pair.
    feats, logits = linear_transform_forward(x, params)
    jax.block_until_ready((feats, logits))
    assert feats.shape == (B, out_feats) and logits.shape == (B, num_classes)
    assert jnp.allclose(feats, rf, atol=2e-2, rtol=2e-2), \
        float(jnp.max(jnp.abs(feats - rf)))
    assert jnp.allclose(logits, rl, atol=2e-2, rtol=2e-2), \
        float(jnp.max(jnp.abs(logits - rl)))

    # Multi-tile path (small tile chosen ONLY to exercise cross-tile BN stats
    # and the streamed batch axis; production callers keep the large default).
    feats2, logits2 = linear_transform_forward(x, params, batch_tile=96)
    jax.block_until_ready((feats2, logits2))
    assert jnp.allclose(feats2, rf, atol=2e-2, rtol=2e-2), \
        float(jnp.max(jnp.abs(feats2 - rf)))
    assert jnp.allclose(logits2, rl, atol=2e-2, rtol=2e-2), \
        float(jnp.max(jnp.abs(logits2 - rl)))

    print("KERNEL_OK")
</pallas_src>

<mosaic_0001>
module attributes {stable_mosaic.version = 11 : i64} {
  func.func @_lt_fused_kernel(%arg0: i32, %arg1: i32, %arg2: memref<200x128xbf16, #tpu.memory_space<vmem>>, %arg3: memref<128x128xbf16, #tpu.memory_space<vmem>>, %arg4: memref<1x128xf32, #tpu.memory_space<vmem>>, %arg5: memref<1x128xf32, #tpu.memory_space<vmem>>, %arg6: memref<128x128xbf16, #tpu.memory_space<vmem>>, %arg7: memref<1x128xf32, #tpu.memory_space<vmem>>, %arg8: memref<128x128xbf16, #tpu.memory_space<vmem>>, %arg9: memref<1x128xf32, #tpu.memory_space<vmem>>, %arg10: memref<200x128xbf16, #tpu.memory_space<vmem>>, %arg11: memref<200x128xf32, #tpu.memory_space<vmem>>, %arg12: memref<8x128xf32, #tpu.memory_space<vmem>>, %arg13: memref<8x128xf32, #tpu.memory_space<vmem>>, %arg14: memref<1x128xf32, #tpu.memory_space<vmem>>, %arg15: memref<1x128xf32, #tpu.memory_space<vmem>>) attributes {dimension_semantics = [#tpu.dimension_semantics<arbitrary>, #tpu.dimension_semantics<arbitrary>], iteration_bounds = array<i64: 2, 1>, scalar_prefetch = 0 : i64, scratch_operands = 4 : i64, tpu.core_type = #tpu.core_type<tc>, window_params = [{transform_indices = @transform_0, window_bounds = array<i64: 200, 128>}, {pipeline_mode = #tpu.pipeline_mode<synchronous>, transform_indices = @transform_1, window_bounds = array<i64: 128, 128>}, {pipeline_mode = #tpu.pipeline_mode<synchronous>, transform_indices = @transform_2, window_bounds = array<i64: 1, 128>}, {pipeline_mode = #tpu.pipeline_mode<synchronous>, transform_indices = @transform_3, window_bounds = array<i64: 1, 128>}, {pipeline_mode = #tpu.pipeline_mode<synchronous>, transform_indices = @transform_4, window_bounds = array<i64: 128, 128>}, {pipeline_mode = #tpu.pipeline_mode<synchronous>, transform_indices = @transform_5, window_bounds = array<i64: 1, 128>}, {pipeline_mode = #tpu.pipeline_mode<synchronous>, transform_indices = @transform_6, window_bounds = array<i64: 128, 128>}, {pipeline_mode = #tpu.pipeline_mode<synchronous>, transform_indices = @transform_7, window_bounds = array<i64: 1, 128>}, {transform_indices = @transform_8, window_bounds = array<i64: 200, 128>}, {transform_indices = @transform_9, window_bounds = array<i64: 200, 128>}]} {
    %c0 = arith.constant 0 : index
    %c0_0 = arith.constant 0 : index
    %0 = vector.load %arg2[%c0, %c0_0] : memref<200x128xbf16, #tpu.memory_space<vmem>>, vector<200x128xbf16>
    %c0_1 = arith.constant 0 : index
    %c0_2 = arith.constant 0 : index
    %1 = vector.load %arg3[%c0_1, %c0_2] : memref<128x128xbf16, #tpu.memory_space<vmem>>, vector<128x128xbf16>
    %cst = arith.constant dense<0.000000e+00> : vector<200x128xf32>
    %2 = tpu.matmul %0, %1, %cst {dimension_numbers = #tpu.dot_dimension_numbers<[1], [0], [0], [1], [0, 0, 1, 1], [], []>} : vector<200x128xbf16>, vector<128x128xbf16>, vector<200x128xf32> -> vector<200x128xf32>
    %c0_i32 = arith.constant 0 : i32
    %3 = arith.cmpi eq, %arg0, %c0_i32 : i32
    %4 = arith.extui %3 : i1 to i32
    %c0_i32_3 = arith.constant 0 : i32
    %5 = arith.cmpi ne, %4, %c0_i32_3 : i32
    scf.if %5 {
      %c0_i32_5 = arith.constant 0 : i32
      %9 = arith.cmpi eq, %arg1, %c0_i32_5 : i32
      %10 = arith.extui %9 : i1 to i32
      %c0_i32_6 = arith.constant 0 : i32
      %11 = arith.cmpi ne, %10, %c0_i32_6 : i32
      scf.if %11 {
        %cst_17 = arith.constant 0.000000e+00 : f32
        %119 = vector.broadcast %cst_17 : f32 to vector<8x128xf32>
        %c0_18 = arith.constant 0 : index
        %c0_19 = arith.constant 0 : index
        %120 = vector.load %arg12[%c0_18, %c0_19] : memref<8x128xf32, #tpu.memory_space<vmem>>, vector<8x128xf32>
        tpu.vector_store %arg12[%c0_18, %c0_19], %119 {strides = array<i32>} : memref<8x128xf32, #tpu.memory_space<vmem>>, vector<8x128xf32>,
        %cst_20 = arith.constant 0.000000e+00 : f32
        %121 = vector.broadcast %cst_20 : f32 to vector<8x128xf32>
        %c0_21 = arith.constant 0 : index
        %c0_22 = arith.constant 0 : index
        %122 = vector.load %arg13[%c0_21, %c0_22] : memref<8x128xf32, #tpu.memory_space<vmem>>, vector<8x128xf32>
        tpu.vector_store %arg13[%c0_21, %c0_22], %121 {strides = array<i32>} : memref<8x128xf32, #tpu.memory_space<vmem>>, vector<8x128xf32>,
      } else {
      }
      %12 = vector.extract_strided_slice %2 {offsets = [0, 0], sizes = [8, 128], strides = [1, 1]} : vector<200x128xf32> to vector<8x128xf32>
      %13 = arith.mulf %12, %12 : vector<8x128xf32>
      %14 = vector.extract_strided_slice %2 {offsets = [8, 0], sizes = [8, 128], strides = [1, 1]} : vector<200x128xf32> to vector<8x128xf32>
      %15 = arith.addf %12, %14 : vector<8x128xf32>
      %16 = arith.mulf %14, %14 : vector<8x128xf32>
      %17 = arith.addf %13, %16 : vector<8x128xf32>
      %18 = vector.extract_strided_slice %2 {offsets = [16, 0], sizes = [8, 128], strides = [1, 1]} : vector<200x128xf32> to vector<8x128xf32>
      %19 = arith.addf %15, %18 : vector<8x128xf32>
      %20 = arith.mulf %18, %18 : vector<8x128xf32>
      %21 = arith.addf %17, %20 : vector<8x128xf32>
      %22 = vector.extract_strided_slice %2 {offsets = [24, 0], sizes = [8, 128], strides = [1, 1]} : vector<200x128xf32> to vector<8x128xf32>
      %23 = arith.addf %19, %22 : vector<8x128xf32>
      %24 = arith.mulf %22, %22 : vector<8x128xf32>
      %25 = arith.addf %21, %24 : vector<8x128xf32>
      %26 = vector.extract_strided_slice %2 {offsets = [32, 0], sizes = [8, 128], strides = [1, 1]} : vector<200x128xf32> to vector<8x128xf32>
      %27 = arith.addf %23, %26 : vector<8x128xf32>
      %28 = arith.mulf %26, %26 : vector<8x128xf32>
      %29 = arith.addf %25, %28 : vector<8x128xf32>
      %30 = vector.extract_strided_slice %2 {offsets = [40, 0], sizes = [8, 128], strides = [1, 1]} : vector<200x128xf32> to vector<8x128xf32>
      %31 = arith.addf %27, %30 : vector<8x128xf32>
      %32 = arith.mulf %30, %30 : vector<8x128xf32>
      %33 = arith.addf %29, %32 : vector<8x128xf32>
      %34 = vector.extract_strided_slice %2 {offsets = [48, 0], sizes = [8, 128], strides = [1, 1]} : vector<200x128xf32> to vector<8x128xf32>
      %35 = arith.addf %31, %34 : vector<8x128xf32>
      %36 = arith.mulf %34, %34 : vector<8x128xf32>
      %37 = arith.addf %33, %36 : vector<8x128xf32>
      %38 = vector.extract_strided_slice %2 {offsets = [56, 0], sizes = [8, 128], strides = [1, 1]} : vector<200x128xf32> to vector<8x128xf32>
      %39 = arith.addf %35, %38 : vector<8x128xf32>
      %40 = arith.mulf %38, %38 : vector<8x128xf32>
      %41 = arith.addf %37, %40 : vector<8x128xf32>
      %42 = vector.extract_strided_slice %2 {offsets = [64, 0], sizes = [8, 128], strides = [1, 1]} : vector<200x128xf32> to vector<8x128xf32>
      %43 = arith.addf %39, %42 : vector<8x128xf32>
      %44 = arith.mulf %42, %42 : vector<8x128xf32>
      %45 = arith.addf %41, %44 : vector<8x128xf32>
      %46 = vector.extract_strided_slice %2 {offsets = [72, 0], sizes = [8, 128], strides = [1, 1]} : vector<200x128xf32> to vector<8x128xf32>
      %47 = arith.addf %43, %46 : vector<8x128xf32>
      %48 = arith.mulf %46, %46 : vector<8x128xf32>
      %49 = arith.addf %45, %48 : vector<8x128xf32>
      %50 = vector.extract_strided_slice %2 {offsets = [80, 0], sizes = [8, 128], strides = [1, 1]} : vector<200x128xf32> to vector<8x128xf32>
      %51 = arith.addf %47, %50 : vector<8x128xf32>
      %52 = arith.mulf %50, %50 : vector<8x128xf32>
      %53 = arith.addf %49, %52 : vector<8x128xf32>
      %54 = vector.extract_strided_slice %2 {offsets = [88, 0], sizes = [8, 128], strides = [1, 1]} : vector<200x128xf32> to vector<8x128xf32>
      %55 = arith.addf %51, %54 : vector<8x128xf32>
      %56 = arith.mulf %54, %54 : vector<8x128xf32>
      %57 = arith.addf %53, %56 : vector<8x128xf32>
      %58 = vector.extract_strided_slice %2 {offsets = [96, 0], sizes = [8, 128], strides = [1, 1]} : vector<200x128xf32> to vector<8x128xf32>
      %59 = arith.addf %55, %58 : vector<8x128xf32>
      %60 = arith.mulf %58, %58 : vector<8x128xf32>
      %61 = arith.addf %57, %60 : vector<8x128xf32>
      %62 = vector.extract_strided_slice %2 {offsets = [104, 0], sizes = [8, 128], strides = [1, 1]} : vector<200x128xf32> to vector<8x128xf32>
      %63 = arith.addf %59, %62 : vector<8x128xf32>
      %64 = arith.mulf %62, %62 : vector<8x128xf32>
      %65 = arith.addf %61, %64 : vector<8x128xf32>
      %66 = vector.extract_strided_slice %2 {offsets = [112, 0], sizes = [8, 128], strides = [1, 1]} : vector<200x128xf32> to vector<8x128xf32>
      %67 = arith.addf %63, %66 : vector<8x128xf32>
      %68 = arith.mulf %66, %66 : vector<8x128xf32>
      %69 = arith.addf %65, %68 : vector<8x128xf32>
      %70 = vector.extract_strided_slice %2 {offsets = [120, 0], sizes = [8, 128], strides = [1, 1]} : vector<200x128xf32> to vector<8x128xf32>
      %71 = arith.addf %67, %70 : vector<8x128xf32>
      %72 = arith.mulf %70, %70 : vector<8x128xf32>
      %73 = arith.addf %69, %72 : vector<8x128xf32>
      %74 = vector.extract_strided_slice %2 {offsets = [128, 0], sizes = [8, 128], strides = [1, 1]} : vector<200x128xf32> to vector<8x128xf32>
      %75 = arith.addf %71, %74 : vector<8x128xf32>
      %76 = arith.mulf %74, %74 : vector<8x128xf32>
      %77 = arith.addf %73, %76 : vector<8x128xf32>
      %78 = vector.extract_strided_slice %2 {offsets = [136, 0], sizes = [8, 128], strides = [1, 1]} : vector<200x128xf32> to vector<8x128xf32>
      %79 = arith.addf %75, %78 : vector<8x128xf32>
      %80 = arith.mulf %78, %78 : vector<8x128xf32>
      %81 = arith.addf %77, %80 : vector<8x128xf32>
      %82 = vector.extract_strided_slice %2 {offsets = [144, 0], sizes = [8, 128], strides = [1, 1]} : vector<200x128xf32> to vector<8x128xf32>
      %83 = arith.addf %79, %82 : vector<8x128xf32>
      %84 = arith.mulf %82, %82 : vector<8x128xf32>
      %85 = arith.addf %81, %84 : vector<8x128xf32>
      %86 = vector.extract_strided_slice %2 {offsets = [152, 0], sizes = [8, 128], strides = [1, 1]} : vector<200x128xf32> to vector<8x128xf32>
      %87 = arith.addf %83, %86 : vector<8x128xf32>
      %88 = arith.mulf %86, %86 : vector<8x128xf32>
      %89 = arith.addf %85, %88 : vector<8x128xf32>
      %90 = vector.extract_strided_slice %2 {offsets = [160, 0], sizes = [8, 128], strides = [1, 1]} : vector<200x128xf32> to vector<8x128xf32>
      %91 = arith.addf %87, %90 : vector<8x128xf32>
      %92 = arith.mulf %90, %90 : vector<8x128xf32>
      %93 = arith.addf %89, %92 : vector<8x128xf32>
      %94 = vector.extract_strided_slice %2 {offsets = [168, 0], sizes = [8, 128], strides = [1, 1]} : vector<200x128xf32> to vector<8x128xf32>
      %95 = arith.addf %91, %94 : vector<8x128xf32>
      %96 = arith.mulf %94, %94 : vector<8x128xf32>
      %97 = arith.addf %93, %96 : vector<8x128xf32>
      %98 = vector.extract_strided_slice %2 {offsets = [176, 0], sizes = [8, 128], strides = [1, 1]} : vector<200x128xf32> to vector<8x128xf32>
      %99 = arith.addf %95, %98 : vector<8x128xf32>
      %100 = arith.mulf %98, %98 : vector<8x128xf32>
      %101 = arith.addf %97, %100 : vector<8x128xf32>
      %102 = vector.extract_strided_slice %2 {offsets = [184, 0], sizes = [8, 128], strides = [1, 1]} : vector<200x128xf32> to vector<8x128xf32>
      %103 = arith.addf %99, %102 : vector<8x128xf32>
      %104 = arith.mulf %102, %102 : vector<8x128xf32>
      %105 = arith.addf %101, %104 : vector<8x128xf32>
      %106 = vector.extract_strided_slice %2 {offsets = [192, 0], sizes = [8, 128], strides = [1, 1]} : vector<200x128xf32> to vector<8x128xf32>
      %107 = arith.addf %103, %106 : vector<8x128xf32>
      %108 = arith.mulf %106, %106 : vector<8x128xf32>
      %109 = arith.addf %105, %108 : vector<8x128xf32>
      %c0_7 = arith.constant 0 : index
      %c0_8 = arith.constant 0 : index
      %110 = vector.load %arg12[%c0_7, %c0_8] : memref<8x128xf32, #tpu.memory_space<vmem>>, vector<8x128xf32>
      %111 = arith.addf %110, %107 : vector<8x128xf32>
      %c0_9 = arith.constant 0 : index
      %c0_10 = arith.constant 0 : index
      %112 = vector.load %arg12[%c0_9, %c0_10] : memref<8x128xf32, #tpu.memory_space<vmem>>, vector<8x128xf32>
      tpu.vector_store %arg12[%c0_9, %c0_10], %111 {strides = array<i32>} : memref<8x128xf32, #tpu.memory_space<vmem>>, vector<8x128xf32>,
      %c0_11 = arith.constant 0 : index
      %c0_12 = arith.constant 0 : index
      %113 = vector.load %arg13[%c0_11, %c0_12] : memref<8x128xf32, #tpu.memory_space<vmem>>, vector<8x128xf32>
      %114 = arith.addf %113, %109 : vector<8x128xf32>
      %c0_13 = arith.constant 0 : index
      %c0_14 = arith.constant 0 : index
      %115 = vector.load %arg13[%c0_13, %c0_14] : memref<8x128xf32, #tpu.memory_space<vmem>>, vector<8x128xf32>
      tpu.vector_store %arg13[%c0_13, %c0_14], %114 {strides = array<i32>} : memref<8x128xf32, #tpu.memory_space<vmem>>, vector<8x128xf32>,
      %c0_i32_15 = arith.constant 0 : i32
      %116 = arith.cmpi eq, %arg1, %c0_i32_15 : i32
      %117 = arith.extui %116 : i1 to i32
      %c0_i32_16 = arith.constant 0 : i32
      %118 = arith.cmpi ne, %117, %c0_i32_16 : i32
      scf.if %118 {
        %c0_17 = arith.constant 0 : index
        %c0_18 = arith.constant 0 : index
        %119 = vector.load %arg12[%c0_17, %c0_18] : memref<8x128xf32, #tpu.memory_space<vmem>>, vector<8x128xf32>
        %cst_19 = arith.constant dense<0.000000e+00> : vector<128xf32>
        %120 = vector.multi_reduction <add>, %119, %cst_19 [0] : vector<8x128xf32> to vector<128xf32>
        %121 = vector.shape_cast %120 : vector<128xf32> to vector<1x128xf32>
        %c0_20 = arith.constant 0 : index
        %c0_21 = arith.constant 0 : index
        %122 = vector.load %arg13[%c0_20, %c0_21] : memref<8x128xf32, #tpu.memory_space<vmem>>, vector<8x128xf32>
        %cst_22 = arith.constant dense<0.000000e+00> : vector<128xf32>
        %123 = vector.multi_reduction <add>, %122, %cst_22 [0] : vector<8x128xf32> to vector<128xf32>
        %124 = vector.shape_cast %123 : vector<128xf32> to vector<1x128xf32>
        %cst_23 = arith.constant 5.000000e-03 : f32
        %125 = vector.broadcast %cst_23 : f32 to vector<1x128xf32>
        %126 = arith.mulf %121, %125 : vector<1x128xf32>
        %cst_24 = arith.constant 5.000000e-03 : f32
        %127 = vector.broadcast %cst_24 : f32 to vector<1x128xf32>
        %128 = arith.mulf %124, %127 : vector<1x128xf32>
        %129 = arith.mulf %126, %126 : vector<1x128xf32>
        %130 = arith.subf %128, %129 : vector<1x128xf32>
        %cst_25 = arith.constant 0.000000e+00 : f32
        %131 = vector.broadcast %cst_25 : f32 to vector<1x128xf32>
        %132 = arith.maximumf %130, %131 : vector<1x128xf32>
        %c0_26 = arith.constant 0 : index
        %c0_27 = arith.constant 0 : index
        %133 = vector.load %arg4[%c0_26, %c0_27] : memref<1x128xf32, #tpu.memory_space<vmem>>, vector<1x128xf32>
        %cst_28 = arith.constant 9.99999974E-6 : f32
        %134 = vector.broadcast %cst_28 : f32 to vector<1x128xf32>
        %135 = arith.addf %132, %134 : vector<1x128xf32>
        %136 = math.rsqrt %135 : vector<1x128xf32>
        %137 = arith.mulf %133, %136 : vector<1x128xf32>
        %c0_29 = arith.constant 0 : index
        %c0_30 = arith.constant 0 : index
        %138 = vector.load %arg14[%c0_29, %c0_30] : memref<1x128xf32, #tpu.memory_space<vmem>>, vector<1x128xf32>
        tpu.vector_store %arg14[%c0_29, %c0_30], %137 {strides = array<i32>} : memref<1x128xf32, #tpu.memory_space<vmem>>, vector<1x128xf32>,
        %c0_31 = arith.constant 0 : index
        %c0_32 = arith.constant 0 : index
        %139 = vector.load %arg5[%c0_31, %c0_32] : memref<1x128xf32, #tpu.memory_space<vmem>>, vector<1x128xf32>
        %140 = arith.mulf %126, %137 : vector<1x128xf32>
        %141 = arith.subf %139, %140 : vector<1x128xf32>
        %c0_33 = arith.constant 0 : index
        %c0_34 = arith.constant 0 : index
        %142 = vector.load %arg15[%c0_33, %c0_34] : memref<1x128xf32, #tpu.memory_space<vmem>>, vector<1x128xf32>
        tpu.vector_store %arg15[%c0_33, %c0_34], %141 {strides = array<i32>} : memref<1x128xf32, #tpu.memory_space<vmem>>, vector<1x128xf32>,
      } else {
      }
    } else {
    }
    %c1_i32 = arith.constant 1 : i32
    %6 = arith.cmpi eq, %arg0, %c1_i32 : i32
    %7 = arith.extui %6 : i1 to i32
    %c0_i32_4 = arith.constant 0 : i32
    %8 = arith.cmpi ne, %7, %c0_i32_4 : i32
    scf.if %8 {
      %c0_5 = arith.constant 0 : index
      %c0_6 = arith.constant 0 : index
      %9 = vector.load %arg14[%c0_5, %c0_6] : memref<1x128xf32, #tpu.memory_space<vmem>>, vector<1x128xf32>
      %10 = vector.broadcast %9 : vector<1x128xf32> to vector<200x128xf32>
      %11 = arith.mulf %2, %10 : vector<200x128xf32>
      %c0_7 = arith.constant 0 : index
      %c0_8 = arith.constant 0 : index
      %12 = vector.load %arg15[%c0_7, %c0_8] : memref<1x128xf32, #tpu.memory_space<vmem>>, vector<1x128xf32>
      %13 = vector.broadcast %12 : vector<1x128xf32> to vector<200x128xf32>
      %14 = arith.addf %11, %13 : vector<200x128xf32>
      %cst_9 = arith.constant 0.00999999977 : f32
      %15 = vector.broadcast %cst_9 : f32 to vector<200x128xf32>
      %16 = arith.mulf %15, %14 : vector<200x128xf32>
      %17 = arith.maximumf %14, %16 : vector<200x128xf32>
      %18 = arith.truncf %17 : vector<200x128xf32> to vector<200x128xbf16>
      %c0_10 = arith.constant 0 : index
      %c0_11 = arith.constant 0 : index
      %19 = vector.load %arg6[%c0_10, %c0_11] : memref<128x128xbf16, #tpu.memory_space<vmem>>, vector<128x128xbf16>
      %cst_12 = arith.constant dense<0.000000e+00> : vector<200x128xf32>
      %20 = tpu.matmul %18, %19, %cst_12 {dimension_numbers = #tpu.dot_dimension_numbers<[1], [0], [0], [1], [0, 0, 1, 1], [], []>} : vector<200x128xbf16>, vector<128x128xbf16>, vector<200x128xf32> -> vector<200x128xf32>
      %c0_13 = arith.constant 0 : index
      %c0_14 = arith.constant 0 : index
      %21 = vector.load %arg7[%c0_13, %c0_14] : memref<1x128xf32, #tpu.memory_space<vmem>>, vector<1x128xf32>
      %22 = vector.broadcast %21 : vector<1x128xf32> to vector<200x128xf32>
      %23 = arith.addf %20, %22 : vector<200x128xf32>
      %24 = arith.truncf %23 : vector<200x128xf32> to vector<200x128xbf16>
      %c0_15 = arith.constant 0 : index
      %c0_16 = arith.constant 0 : index
      %25 = vector.load %arg10[%c0_15, %c0_16] : memref<200x128xbf16, #tpu.memory_space<vmem>>, vector<200x128xbf16>
      tpu.vector_store %arg10[%c0_15, %c0_16], %24 {strides = array<i32>} : memref<200x128xbf16, #tpu.memory_space<vmem>>, vector<200x128xbf16>,
      %26 = arith.truncf %23 : vector<200x128xf32> to vector<200x128xbf16>
      %c0_17 = arith.constant 0 : index
      %c0_18 = arith.constant 0 : index
      %27 = vector.load %arg8[%c0_17, %c0_18] : memref<128x128xbf16, #tpu.memory_space<vmem>>, vector<128x128xbf16>
      %cst_19 = arith.constant dense<0.000000e+00> : vector<200x128xf32>
      %28 = tpu.matmul %26, %27, %cst_19 {dimension_numbers = #tpu.dot_dimension_numbers<[1], [0], [0], [1], [0, 0, 1, 1], [], []>} : vector<200x128xbf16>, vector<128x128xbf16>, vector<200x128xf32> -> vector<200x128xf32>
      %c0_20 = arith.constant 0 : index
      %c0_21 = arith.constant 0 : index
      %29 = vector.load %arg9[%c0_20, %c0_21] : memref<1x128xf32, #tpu.memory_space<vmem>>, vector<1x128xf32>
      %30 = vector.broadcast %29 : vector<1x128xf32> to vector<200x128xf32>
      %31 = arith.addf %28, %30 : vector<200x128xf32>
      %c0_22 = arith.constant 0 : index
      %c0_23 = arith.constant 0 : index
      %32 = vector.load %arg11[%c0_22, %c0_23] : memref<200x128xf32, #tpu.memory_space<vmem>>, vector<200x128xf32>
      tpu.vector_store %arg11[%c0_22, %c0_23], %31 {strides = array<i32>} : memref<200x128xf32, #tpu.memory_space<vmem>>, vector<200x128xf32>,
    } else {
    }
    return
  }
  func.func @transform_0(%arg0: i32, %arg1: i32) -> (i32, i32) {
    %c0_i32 = arith.constant 0 : i32
    %c0_i32_0 = arith.constant 0 : i32
    return %arg1, %c0_i32 : i32, i32
  }
  func.func @transform_1(%arg0: i32, %arg1: i32) -> (i32, i32) {
    %c0_i32 = arith.constant 0 : i32
    %c0_i32_0 = arith.constant 0 : i32
    %c0_i32_1 = arith.constant 0 : i32
    return %c0_i32, %c0_i32_0 : i32, i32
  }
  func.func @transform_2(%arg0: i32, %arg1: i32) -> (i32, i32) {
    %c0_i32 = arith.constant 0 : i32
    %c0_i32_0 = arith.constant 0 : i32
    %c0_i32_1 = arith.constant 0 : i32
    return %c0_i32, %c0_i32_0 : i32, i32
  }
  func.func @transform_3(%arg0: i32, %arg1: i32) -> (i32, i32) {
    %c0_i32 = arith.constant 0 : i32
    %c0_i32_0 = arith.constant 0 : i32
    %c0_i32_1 = arith.constant 0 : i32
    return %c0_i32, %c0_i32_0 : i32, i32
  }
  func.func @transform_4(%arg0: i32, %arg1: i32) -> (i32, i32) {
    %c0_i32 = arith.constant 0 : i32
    %c0_i32_0 = arith.constant 0 : i32
    %c0_i32_1 = arith.constant 0 : i32
    return %c0_i32, %c0_i32_0 : i32, i32
  }
  func.func @transform_5(%arg0: i32, %arg1: i32) -> (i32, i32) {
    %c0_i32 = arith.constant 0 : i32
    %c0_i32_0 = arith.constant 0 : i32
    %c0_i32_1 = arith.constant 0 : i32
    return %c0_i32, %c0_i32_0 : i32, i32
  }
  func.func @transform_6(%arg0: i32, %arg1: i32) -> (i32, i32) {
    %c0_i32 = arith.constant 0 : i32
    %c0_i32_0 = arith.constant 0 : i32
    %c0_i32_1 = arith.constant 0 : i32
    return %c0_i32, %c0_i32_0 : i32, i32
  }
  func.func @transform_7(%arg0: i32, %arg1: i32) -> (i32, i32) {
    %c0_i32 = arith.constant 0 : i32
    %c0_i32_0 = arith.constant 0 : i32
    %c0_i32_1 = arith.constant 0 : i32
    return %c0_i32, %c0_i32_0 : i32, i32
  }
  func.func @transform_8(%arg0: i32, %arg1: i32) -> (i32, i32) {
    %0 = arith.muli %arg1, %arg0 : i32
    %c0_i32 = arith.constant 0 : i32
    %c0_i32_0 = arith.constant 0 : i32
    return %0, %c0_i32 : i32, i32
  }
  func.func @transform_9(%arg0: i32, %arg1: i32) -> (i32, i32) {
    %0 = arith.muli %arg1, %arg0 : i32
    %c0_i32 = arith.constant 0 : i32
    %c0_i32_0 = arith.constant 0 : i32
    return %0, %c0_i32 : i32, i32
  }
}

</mosaic_0001>

<bundles_post_ra>
// kernel: tpu_custom_call.1
= control target key start
LH: loop header
LB: loop body
LE: loop exit
PB: predicated region body
PF: predicated region fallthrough
CT: control target
= control target key end

     0   :  { %s3183_s0 = inlined_call_operand.hbm [shape: bf16[200,128], index: 0, kind: input, shape index: {}]   ;;  %s3184_s1 = inlined_call_operand.hbm [shape: bf16[128,128], index: 1, kind: input, shape index: {}]   ;;  %s3185_s2 = inlined_call_operand.vmem [shape: f32[1,128], index: 2, kind: input, shape index: {}]   ;;  %s3186_s3 = inlined_call_operand.vmem [shape: f32[1,128], index: 3, kind: input, shape index: {}]   ;;  %s3187_s4 = inlined_call_operand.hbm [shape: bf16[128,128], index: 4, kind: input, shape index: {}]   ;;  %s3188_s5 = inlined_call_operand.vmem [shape: f32[1,128], index: 5, kind: input, shape index: {}]   ;;  %s3189_s6 = inlined_call_operand.hbm [shape: bf16[128,128], index: 6, kind: input, shape index: {}]   ;;  %s3190_s7 = inlined_call_operand.vmem [shape: f32[1,128], index: 7, kind: input, shape index: {}]   ;;  %s3191_s8 = inlined_call_operand.hbm [shape: bf16[200,128], index: 8, kind: output, shape index: {0}]   ;;  %s3192_s9 = inlined_call_operand.hbm [shape: f32[200,128], index: 9, kind: output, shape index: {1}]  }
   0x1   :  { %3199 = sst [smem:[#allocation23_spill]] %s3192_s9 }
   0x2   :  { %15 = vsyncpa [#allocation7], 0 }
   0x3   :  { %16 = vsyncpa [#allocation10], 0 }
   0x4   :  { %17 = vsyncpa [#allocation13], 0 }
   0x5   :  { %18 = vsyncpa [#allocation8], 0 }
   0x6   :  { %20 = vsyncpa [#allocation8 + $0x1], 0 }
   0x7   :  { %21 = vsyncpa [#allocation16], 0 }
   0x8   :  { %23 = vsyncpa [#allocation16 + $0x1], 0  ;;  %s2573_s30 = smov 0   ;;  %s2575_s10 = smov 0  }
   0x9   :  { %s2577_s11 = smov 0  }
   0xa LB: > { %3200 = sst [smem:[#allocation22_spill]] %s2501_s10  ;;  %s3196_s12 = sadd.s32 4294967295, %s2505_s11   ;;  %s2505_s11 = sphi %s2577_s11, %s29_s11   ;;  %s2501_s10 = sphi %s2575_s10, %s3214_s10   ;;  %s2497_s30 = sphi %s2573_s30, %s3213_s30  }
   0xb   : > { %p1700_p0 = scmp.ge.s32.totalorder %s2505_s11, 1  ;;  %p275_p1 = scmp.lt.s32.totalorder %s2505_s11, 3 }
   0xc   : > { %p2594_p2 = scmp.eq.s32.totalorder %s3196_s12, 0  ;;  %s2507_s16 = smov [#allocation9]  }
   0xd   : > { %p2598_p3 = pnand %p1700_p0, %p275_p1  ;;  %s303_s17 = sshll.u32 %s2507_s16, 4  ;;  %s304_s17 = int_to_ptr.vmem [resolvable:$true] %s303_s17 }
   0xe   : > { %s3201_s14 = scalar_select %p2594_p2, 1, 0 }
   0xf   : > { %s3202_s15 = scalar_select %p2598_p3, 1, 0 }
  0x10   : > { %p2187_p4 = pneg %p2598_p3  ;;  %s41_s19 = sadd.s32 1, %s2501_s10 }
  0x11   : > { %p2611_p6 = scmp.ge.s32.totalorder %s41_s19, 2  ;;  %s2299_s23 = scalar_lea.hbm %s3184_s1, 1024 }
  0x12   : > { %p2606_p5 = pnand %p2594_p2, %p2187_p4  ;;  %p2300_p7 = scmp.ne.s32.totalorder %s3184_s1, %s2299_s23 }
  0x13   : > { %s3204_s20 = scalar_select %p2611_p6, 1, 0 }
  0x14   : > { %p2623_p8 = pneg %p2606_p5  ;;  %p2306_p11 = scmp.lt.u32.totalorder %s2299_s23, %s3184_s1 }
  0x16   : > { %p2302_p9 = pnand %p2623_p8, %p2300_p7 }
  0x18   : > { %p2303_p10 = pneg %p2302_p9 }
  0x1a   : > { %p2308_p12 = pnand %p2306_p11, %p2303_p10 }
  0x1c   : > { %2311 = shalt.err (!%p2308_p12)
}
  0x1d   : > { %s2312_s29 = scalar_lea.vmem %s304_s17, 1024  ;;  %p2320_p4 = scmp.lt.s32.totalorder %s304_s17, %s304_s17 }
  0x1e   : > { %p2313_p13 = scmp.ne.s32.totalorder %s304_s17, %s2312_s29  ;;  %p2321_p2 = scmp.lt.s32.totalorder %s2312_s29, %s2312_s29 }
  0x20   : > { %p2315_p0 = pnand %p2313_p13, %p2623_p8  ;;  %p2322_p3 = por %p2321_p2, %p2320_p4 }
  0x22   : > { %p2316_p1 = pneg %p2315_p0 }
  0x24   : > { %p2323_p6 = pnand %p2322_p3, %p2316_p1 }
  0x26   : > { %2326 = shalt.err (!%p2323_p6)
}
  0x27   : > { %s2508_s16 = smov 64   ;;  %s2509_s21 = smov 4  }
  0x28   : > { %2193 = dma.hbm_to_vmem [thread:$0]  (!%p2606_p5), %s3184_s1, 1024, %s304_s17, [#allocation10], %s2508_s16, %s2508_s16, %s2509_s21  }
  0x29   : > { %p3206_p7 = scmp.ne.s32.totalorder %s3204_s20, 0  ;;  %s2510_s24 = smov [#allocation6]  }
  0x2a   : > { %s290_s25 = sshll.u32 %s2510_s24, 4  ;;  %s2511_s27 = smov [#allocation11]   ;;  %s291_s25 = int_to_ptr.vmem [resolvable:$true] %s290_s25 }
  0x2b   : > { %s3216_s19 = smov (%p3206_p7, %s41_s19), 0  ;;  %s322_s28 = sshll.u32 %s2511_s27, 4  ;;  %s323_s28 = int_to_ptr.vmem [resolvable:$true] %s322_s28 }
  0x2c   : > { %s2327_s12 = scalar_lea.hbm %s3183_s0, 1600 }
  0x2d   : > { %p2328_p2 = scmp.ne.s32.totalorder %s3183_s0, %s2327_s12  ;;  %p2334_p9 = scmp.lt.u32.totalorder %s2327_s12, %s3183_s0 }
  0x2f   : > { %p2330_p3 = pnand %p2328_p2, %p2623_p8 }
  0x31   : > { %p2331_p6 = pneg %p2330_p3 }
  0x33   : > { %p2336_p10 = pnand %p2334_p9, %p2331_p6 }
  0x35   : > { %2339 = shalt.err (!%p2336_p10)
}
  0x36   : > { %s2340_s22 = scalar_lea.vmem %s291_s25, 1600  ;;  %p2348_p0 = scmp.lt.s32.totalorder %s291_s25, %s291_s25 }
  0x37   : > { %p2341_p11 = scmp.ne.s32.totalorder %s291_s25, %s2340_s22  ;;  %p2349_p1 = scmp.lt.s32.totalorder %s2340_s22, %s2340_s22 }
  0x39   : > { %p2343_p12 = pnand %p2341_p11, %p2623_p8  ;;  %p2350_p4 = por %p2349_p1, %p2348_p0 }
  0x3b   : > { %p2344_p13 = pneg %p2343_p12 }
  0x3d   : > { %p2351_p7 = pnand %p2350_p4, %p2344_p13 }
  0x3f   : > { %2354 = shalt.err (!%p2351_p7)
}
  0x40   : > { %2190 = dma.hbm_to_vmem [thread:$0]  (!%p2606_p5), %s3183_s0, 1600, %s291_s25, [#allocation7], %s2508_s16, %s2508_s16, %s2509_s21  }
  0x41   : > { %s2355_s23 = scalar_lea.hbm %s3187_s4, 1024 }
  0x42   : > { %p2356_p2 = scmp.ne.s32.totalorder %s3187_s4, %s2355_s23  ;;  %p2362_p9 = scmp.lt.u32.totalorder %s2355_s23, %s3187_s4 }
  0x44   : > { %p2358_p3 = pnand %p2356_p2, %p2623_p8 }
  0x46   : > { %p2359_p6 = pneg %p2358_p3 }
  0x48   : > { %p2364_p10 = pnand %p2362_p9, %p2359_p6 }
  0x4a   : > { %2367 = shalt.err (!%p2364_p10)
}
  0x4b   : > { %s2368_s20 = scalar_lea.vmem %s323_s28, 1024  ;;  %p2376_p0 = scmp.lt.s32.totalorder %s323_s28, %s323_s28 }
  0x4c   : > { %p2369_p11 = scmp.ne.s32.totalorder %s323_s28, %s2368_s20  ;;  %p2377_p1 = scmp.lt.s32.totalorder %s2368_s20, %s2368_s20 }
  0x4e   : > { %p2371_p12 = pnand %p2369_p11, %p2623_p8  ;;  %p2378_p4 = por %p2377_p1, %p2376_p0 }
  0x50   : > { %p2372_p13 = pneg %p2371_p12 }
  0x52   : > { %p2379_p7 = pnand %p2378_p4, %p2372_p13 }
  0x54   : > { %2382 = shalt.err (!%p2379_p7)
}
  0x55   : > { %2196 = dma.hbm_to_vmem [thread:$0]  (!%p2606_p5), %s3187_s4, 1024, %s323_s28, [#allocation10], %s2508_s16, %s2508_s16, %s2509_s21  }
  0x56   : > { %s2512_s9 = smov [#allocation12]   ;;  %s2383_s23 = scalar_lea.hbm %s3189_s6, 1024 }
  0x57   : > { %s338_s10 = sshll.u32 %s2512_s9, 4  ;;  %p2384_p2 = scmp.ne.s32.totalorder %s3189_s6, %s2383_s23  ;;  %s339_s10 = int_to_ptr.vmem [resolvable:$true] %s338_s10 }
  0x58   : > { %p2390_p9 = scmp.lt.u32.totalorder %s2383_s23, %s3189_s6 }
  0x59   : > { %p2386_p3 = pnand %p2384_p2, %p2623_p8 }
  0x5b   : > { %p2387_p6 = pneg %p2386_p3 }
  0x5d   : > { %p2392_p10 = pnand %p2390_p9, %p2387_p6 }
  0x5f   : > { %2395 = shalt.err (!%p2392_p10)
}
  0x60   : > { %s2396_s28 = scalar_lea.vmem %s339_s10, 1024  ;;  %p2404_p0 = scmp.lt.s32.totalorder %s339_s10, %s339_s10 }
  0x61   : > { %p2397_p11 = scmp.ne.s32.totalorder %s339_s10, %s2396_s28  ;;  %p2405_p1 = scmp.lt.s32.totalorder %s2396_s28, %s2396_s28 }
  0x63   : > { %p2399_p12 = pnand %p2397_p11, %p2623_p8  ;;  %p2406_p4 = por %p2405_p1, %p2404_p0 }
  0x65   : > { %p2400_p13 = pneg %p2399_p12 }
  0x67   : > { %p2407_p7 = pnand %p2406_p4, %p2400_p13 }
  0x69   : > { %2410 = shalt.err (!%p2407_p7)
}
  0x6a   : > { %2199 = dma.hbm_to_vmem [thread:$0]  (!%p2606_p5), %s3189_s6, 1024, %s339_s10, [#allocation13], %s2508_s16, %s2508_s16, %s2509_s21  }
  0x6b   : > { %p3207_p2 = scmp.ne.s32.totalorder %s3202_s15, 0 }
  0x6c   : > { %p3208_p8 = scmp.ne.s32.totalorder (!%p3207_p2), %s3201_s14, 0 }
  0x6d   : > { %357 = sbr.rel (%p3207_p2) target bundleno = 1099 (0x44b), region = 52 }
  0x74   : > { %2476 = dma.done.wait (%p3208_p8), [#allocation7], 1600  }
  0x75   : > { %2478 = vsyncadd (%p3208_p8), [#allocation7], 4294965696 }
  0x76   : > { %2480 = dma.done.wait (%p3208_p8), [#allocation10], 2048  }
  0x77   : > { %2482 = vsyncadd (%p3208_p8), [#allocation10], 4294965248 }
  0x78   : > { %2484 = dma.done.wait (%p3208_p8), [#allocation13], 1024  }
  0x79   : > { %2486 = vsyncadd (%p3208_p8), [#allocation13], 4294966272  ;;  %v2513_v0 = vmov 0.0   ;;  %vm2514_vm0 = vmmov 0   ;;  %v2260_v1 = vld [vmem:[#allocation9] sm:$0xff]   ;;  %v2261_v2 = vld [vmem:[#allocation9 + $0x8] sm:$0xff]  }
  0x7a   : > { %1943 = vmatprep.subr.bf16.mxu0 %v2513_v0  ;;  %2147 = vmatprep.subr.bf16.mxu1 %v2513_v0  ;;  %v2262_v3 = vld [vmem:[#allocation9 + $0x10] sm:$0xff]   ;;  %v2263_v4 = vld [vmem:[#allocation9 + $0x18] sm:$0xff]   ;;  %v2264_v5 = vld [vmem:[#allocation9 + $0x20] sm:$0xff]   ;;  %p1731_p5 = scmp.ne.s32.totalorder %s2497_s30, 0 }
  0x7b   : > { %1959 = vmatprep.mubr.msk.bf16.mxu0 %vm2514_vm0, %v2513_v0  ;;  %1987 = vmatprep.mubr.msk.bf16.mxu1 %vm2514_vm0, %v2513_v0  ;;  %v2265_v6 = vld [vmem:[#allocation9 + $0x28] sm:$0xff]   ;;  %v2266_v7 = vld [vmem:[#allocation9 + $0x30] sm:$0xff]   ;;  %v2267_v8 = vld [vmem:[#allocation9 + $0x38] sm:$0xff]  }
  0x7c   : > { %1944 = vmatpush3.bf16.msra.mxu0 %v2260_v1  ;;  %2155 = vmatpush3.bf16.msra.mxu1 %v2260_v1  ;;  %v2268_v9 = vld [vmem:[#allocation6] sm:$0xff]   ;;  %v2269_v10 = vld [vmem:[#allocation6 + $0x38] sm:$0xff]   ;;  %v2270_v11 = vld [vmem:[#allocation6 + $0x8] sm:$0xff]  }
  0x7d   : > { %1945 = vmatprep.subr.bf16.mxu0 %v2513_v0  ;;  %2148 = vmatprep.subr.bf16.mxu1 %v2513_v0  ;;  %v2271_v12 = vld [vmem:[#allocation6 + $0x40] sm:$0xff]   ;;  %v2272_v13 = vld [vmem:[#allocation6 + $0x10] sm:$0xff]   ;;  %v2273_v14 = vld [vmem:[#allocation6 + $0x48] sm:$0xff]  }
  0x7e   : > { %v2274_v15 = vld [vmem:[#allocation6 + $0x18] sm:$0xff]   ;;  %v2275_v16 = vld [vmem:[#allocation6 + $0x50] sm:$0xff]   ;;  %v2276_v17 = vld [vmem:[#allocation6 + $0x20] sm:$0xff]  }
  0x7f   : > { %v2277_v18 = vld [vmem:[#allocation6 + $0x58] sm:$0xff]   ;;  %v2278_v19 = vld [vmem:[#allocation6 + $0x28] sm:$0xff]   ;;  %v2279_v20 = vld [vmem:[#allocation6 + $0x60] ss:$0 sps:$4 sm:$0xff]  }
  0x80   : > { %1946 = vmatpush3.bf16.msra.mxu0 %v2261_v2  ;;  %2156 = vmatpush3.bf16.msra.mxu1 %v2261_v2  ;;  %v2280_v21 = vld [vmem:[#allocation6 + $0x30] sm:$0xff]  }
  0x81   : > { %1947 = vmatprep.subr.bf16.mxu0 %v2513_v0  ;;  %2149 = vmatprep.subr.bf16.mxu1 %v2513_v0 }
  0x84   : > { %1948 = vmatpush3.bf16.msra.mxu0 %v2262_v3  ;;  %2157 = vmatpush3.bf16.msra.mxu1 %v2262_v3 }
  0x85   : > { %1949 = vmatprep.subr.bf16.mxu0 %v2513_v0  ;;  %2150 = vmatprep.subr.bf16.mxu1 %v2513_v0 }
  0x88   : > { %1950 = vmatpush3.bf16.msra.mxu0 %v2263_v4  ;;  %2158 = vmatpush3.bf16.msra.mxu1 %v2263_v4 }
  0x89   : > { %1951 = vmatprep.subr.bf16.mxu0 %v2513_v0  ;;  %2151 = vmatprep.subr.bf16.mxu1 %v2513_v0 }
  0x8c   : > { %1952 = vmatpush3.bf16.msra.mxu0 %v2264_v5  ;;  %2159 = vmatpush3.bf16.msra.mxu1 %v2264_v5 }
  0x8d   : > { %1953 = vmatprep.subr.bf16.mxu0 %v2513_v0  ;;  %2152 = vmatprep.subr.bf16.mxu1 %v2513_v0 }
  0x90   : > { %1954 = vmatpush3.bf16.msra.mxu0 %v2265_v6  ;;  %2160 = vmatpush3.bf16.msra.mxu1 %v2265_v6 }
  0x91   : > { %1955 = vmatprep.subr.bf16.mxu0 %v2513_v0  ;;  %2153 = vmatprep.subr.bf16.mxu1 %v2513_v0 }
  0x94   : > { %1956 = vmatpush3.bf16.msra.mxu0 %v2266_v7  ;;  %2161 = vmatpush3.bf16.msra.mxu1 %v2266_v7 }
  0x95   : > { %1957 = vmatprep.subr.bf16.mxu0 %v2513_v0  ;;  %2154 = vmatprep.subr.bf16.mxu1 %v2513_v0 }
  0x98   : > { %1958 = vmatpush3.bf16.msra.mxu0 %v2267_v8  ;;  %2162 = vmatpush3.bf16.msra.mxu1 %v2267_v8 }
  0x9b   : > { %1960 = vmatmul.mubr.bf16.vlgmr.msra.gmra.mrb[0].mxu0 %v2268_v9  ;;  %1988 = vmatmul.mubr.bf16.vlgmr.msra.gmra.mrb[0].mxu1 %v2269_v10 }
  0x9c   : > { %1963 = vmatprep.mubr.msk.bf16.mxu0 %vm2514_vm0, %v2513_v0  ;;  %1991 = vmatprep.mubr.msk.bf16.mxu1 %vm2514_vm0, %v2513_v0 }
  0xa3   : > { %1964 = vmatmul.mubr.bf16.gmra.mrb[4].mxu0 %v2270_v11  ;;  %1992 = vmatmul.mubr.bf16.gmra.mrb[4].mxu1 %v2271_v12 }
  0xa4   : > { %1967 = vmatprep.mubr.msk.bf16.mxu0 %vm2514_vm0, %v2513_v0  ;;  %1995 = vmatprep.mubr.msk.bf16.mxu1 %vm2514_vm0, %v2513_v0 }
  0xab   : > { %1968 = vmatmul.mubr.bf16.gmra.mrb[8].mxu0 %v2272_v13  ;;  %1996 = vmatmul.mubr.bf16.gmra.mrb[8].mxu1 %v2273_v14 }
  0xac   : > { %1971 = vmatprep.mubr.msk.bf16.mxu0 %vm2514_vm0, %v2513_v0  ;;  %1999 = vmatprep.mubr.msk.bf16.mxu1 %vm2514_vm0, %v2513_v0 }
  0xb3   : > { %1972 = vmatmul.mubr.bf16.gmra.mrb[12].mxu0 %v2274_v15  ;;  %2000 = vmatmul.mubr.bf16.gmra.mrb[12].mxu1 %v2275_v16 }
  0xb4   : > { %1975 = vmatprep.mubr.msk.bf16.mxu0 %vm2514_vm0, %v2513_v0  ;;  %2003 = vmatprep.mubr.msk.bf16.mxu1 %vm2514_vm0, %v2513_v0 }
  0xbb   : > { %1976 = vmatmul.mubr.bf16.gmra.mrb[16].mxu0 %v2276_v17  ;;  %2004 = vmatmul.mubr.bf16.gmra.mrb[16].mxu1 %v2277_v18 }
  0xbc   : > { %1979 = vmatprep.mubr.msk.bf16.mxu0 %vm2514_vm0, %v2513_v0  ;;  %2007 = vmatprep.mubr.msk.bf16.mxu1 %vm2514_vm0, %v2513_v0 }
  0xc3   : > { %1980 = vmatmul.mubr.bf16.gmra.mrb[20].mxu0 %v2278_v19  ;;  %2008 = vmatmul.mubr.bf16.gmra.mrb[20].mxu1 %v2279_v20 }
  0xc4   : > { %1983 = vmatprep.mubr.msk.bf16.mxu0 %vm2514_vm0, %v2513_v0 }
  0xcb   : > { %1984 = vmatmul.mubr.bf16.gmra.mrb[24].mxu0 %v2280_v21 }
 0x16e   : > { %v2765_v22 = vpop.f32.mrb[0].mxu0  ;;  %v2767_v23 = vpop.f32.mrb[0].mxu1 }
 0x16f   : > { %v1961_v24 = vpop.f32.mrb[1].mxu0  ;;  %v1989_v25 = vpop.f32.mrb[1].mxu1  ;;  %v722_v10 = vmul.f32 (!%p1731_p5), %v2765_v22, %v2765_v22 }
 0x170   : > { %v2769_v26 = vpop.f32.mrb[2].mxu0  ;;  %v2771_v27 = vpop.f32.mrb[2].mxu1 }
 0x171   : > { %v1962_v28 = vpop.f32.mrb[3].mxu0  ;;  %v1990_v29 = vpop.f32.mrb[3].mxu1  ;;  %v723_v11 = vadd.f32 (!%p1731_p5), %v2769_v26, %v2765_v22  ;;  %v724_v12 = vmul.f32 (!%p1731_p5), %v2769_v26, %v2769_v26 }
 0x173   : > { %v725_v14 = vadd.f32 (!%p1731_p5), %v724_v12, %v722_v10  ;;  %v763_v10 = vmul.f32 (!%p1731_p5), %v2767_v23, %v2767_v23 }
 0x176   : > { %v2773_v30 = vpop.f32.mrb[4].mxu0  ;;  %v2775_v31 = vpop.f32.mrb[4].mxu1 }
 0x177   : > { %v1965_v32 = vpop.f32.mrb[5].mxu0  ;;  %v1993_v33 = vpop.f32.mrb[5].mxu1  ;;  %v727_v13 = vmul.f32 (!%p1731_p5), %v2773_v30, %v2773_v30  ;;  %v726_v15 = vadd.f32 (!%p1731_p5), %v723_v11, %v2773_v30 }
 0x178   : > { %v2777_v34 = vpop.f32.mrb[6].mxu0  ;;  %v2779_v35 = vpop.f32.mrb[6].mxu1 }
 0x179   : > { %v1966_v36 = vpop.f32.mrb[7].mxu0  ;;  %v1994_v37 = vpop.f32.mrb[7].mxu1  ;;  %v730_v16 = vmul.f32 (!%p1731_p5), %v2777_v34, %v2777_v34  ;;  %v728_v17 = vadd.f32 (!%p1731_p5), %v727_v13, %v725_v14  ;;  %v729_v18 = vadd.f32 (!%p1731_p5), %v726_v15, %v2777_v34  ;;  %v766_v13 = vmul.f32 (!%p1731_p5), %v2771_v27, %v2771_v27 }
 0x17b   : > { %v731_v20 = vadd.f32 (!%p1731_p5), %v730_v16, %v728_v17  ;;  %v769_v16 = vmul.f32 (!%p1731_p5), %v2775_v31, %v2775_v31 }
 0x17e   : > { %v2781_v38 = vpop.f32.mrb[8].mxu0  ;;  %v2783_v39 = vpop.f32.mrb[8].mxu1 }
 0x17f   : > { %v1969_v40 = vpop.f32.mrb[9].mxu0  ;;  %v1997_v41 = vpop.f32.mrb[9].mxu1  ;;  %v733_v19 = vmul.f32 (!%p1731_p5), %v2781_v38, %v2781_v38  ;;  %v732_v21 = vadd.f32 (!%p1731_p5), %v729_v18, %v2781_v38 }
 0x180   : > { %v2785_v42 = vpop.f32.mrb[10].mxu0  ;;  %v2787_v43 = vpop.f32.mrb[10].mxu1 }
 0x181   : > { %v1970_v44 = vpop.f32.mrb[11].mxu0  ;;  %v1998_v45 = vpop.f32.mrb[11].mxu1  ;;  %v736_v24 = vmul.f32 (!%p1731_p5), %v2785_v42, %v2785_v42  ;;  %v734_v25 = vadd.f32 (!%p1731_p5), %v733_v19, %v731_v20  ;;  %v735_v28 = vadd.f32 (!%p1731_p5), %v732_v21, %v2785_v42  ;;  %v772_v19 = vmul.f32 (!%p1731_p5), %v2779_v35, %v2779_v35 }
 0x183   : > { %v737_v32 = vadd.f32 (!%p1731_p5), %v736_v24, %v734_v25  ;;  %v775_v24 = vmul.f32 (!%p1731_p5), %v2783_v39, %v2783_v39 }
 0x186   : > { %v2789_v46 = vpop.f32.mrb[12].mxu0  ;;  %v2791_v47 = vpop.f32.mrb[12].mxu1 }
 0x187   : > { %v1973_v48 = vpop.f32.mrb[13].mxu0  ;;  %v2001_v49 = vpop.f32.mrb[13].mxu1  ;;  %v739_v29 = vmul.f32 (!%p1731_p5), %v2789_v46, %v2789_v46  ;;  %v738_v33 = vadd.f32 (!%p1731_p5), %v735_v28, %v2789_v46 }
 0x188   : > { %v2793_v50 = vpop.f32.mrb[14].mxu0  ;;  %v2795_v51 = vpop.f32.mrb[14].mxu1 }
 0x189   : > { %v1974_v52 = vpop.f32.mrb[15].mxu0  ;;  %v2002_v53 = vpop.f32.mrb[15].mxu1  ;;  %v742_v36 = vmul.f32 (!%p1731_p5), %v2793_v50, %v2793_v50  ;;  %v740_v37 = vadd.f32 (!%p1731_p5), %v739_v29, %v737_v32  ;;  %v741_v40 = vadd.f32 (!%p1731_p5), %v738_v33, %v2793_v50  ;;  %v778_v29 = vmul.f32 (!%p1731_p5), %v2787_v43, %v2787_v43 }
 0x18b   : > { %v743_v44 = vadd.f32 (!%p1731_p5), %v742_v36, %v740_v37  ;;  %v781_v36 = vmul.f32 (!%p1731_p5), %v2791_v47, %v2791_v47 }
 0x18e   : > { %v2797_v54 = vpop.f32.mrb[16].mxu0  ;;  %v2799_v55 = vpop.f32.mrb[16].mxu1 }
 0x18f   : > { %v1977_v56 = vpop.f32.mrb[17].mxu0  ;;  %v2005_v57 = vpop.f32.mrb[17].mxu1  ;;  %v745_v41 = vmul.f32 (!%p1731_p5), %v2797_v54, %v2797_v54  ;;  %v744_v45 = vadd.f32 (!%p1731_p5), %v741_v40, %v2797_v54 }
 0x190   : > { %v2801_v58 = vpop.f32.mrb[18].mxu0  ;;  %v2803_v59 = vpop.f32.mrb[18].mxu1 }
 0x191   : > { %v1978_v60 = vpop.f32.mrb[19].mxu0  ;;  %v2006_v61 = vpop.f32.mrb[19].mxu1  ;;  %v748_v48 = vmul.f32 (!%p1731_p5), %v2801_v58, %v2801_v58  ;;  %v746_v49 = vadd.f32 (!%p1731_p5), %v745_v41, %v743_v44  ;;  %v747_v52 = vadd.f32 (!%p1731_p5), %v744_v45, %v2801_v58  ;;  %v784_v41 = vmul.f32 (!%p1731_p5), %v2795_v51, %v2795_v51 }
 0x193   : > { %v749_v56 = vadd.f32 (!%p1731_p5), %v748_v48, %v746_v49  ;;  %v787_v48 = vmul.f32 (!%p1731_p5), %v2799_v55, %v2799_v55 }
 0x196   : > { %v2805_v62 = vpop.f32.mrb[20].mxu0  ;;  %v2807_v63 = vpop.f32.mrb[20].mxu1 }
 0x197   : > { %v1981_v0 = vpop.f32.mrb[21].mxu0  ;;  %v2009_v1 = vpop.f32.mrb[21].mxu1  ;;  %v751_v53 = vmul.f32 (!%p1731_p5), %v2805_v62, %v2805_v62  ;;  %v750_v57 = vadd.f32 (!%p1731_p5), %v747_v52, %v2805_v62 }
 0x198   : > { %v2809_v2 = vpop.f32.mrb[22].mxu0  ;;  %v709_v3 = vpop.f32.mrb[22].mxu1 }
 0x199   : > { %v1982_v4 = vpop.f32.mrb[23].mxu0  ;;  %v2010_v5 = vpop.f32.mrb[23].mxu1  ;;  %v754_v60 = vmul.f32 (!%p1731_p5), %v2809_v2, %v2809_v2  ;;  %v752_v61 = vadd.f32 (!%p1731_p5), %v751_v53, %v749_v56  ;;  %v753_v0 = vadd.f32 (!%p1731_p5), %v750_v57, %v2809_v2  ;;  %v790_v53 = vmul.f32 (!%p1731_p5), %v2803_v59, %v2803_v59 }
 0x19b   : > { %715 = sbr.rel (%p1731_p5) target bundleno = 482 (0x1e2), region = 72  ;;  %v755_v3 = vadd.f32 (!%p1731_p5), %v754_v60, %v752_v61  ;;  %v793_v60 = vmul.f32 (!%p1731_p5), %v2807_v63, %v2807_v63 }
 0x19e   : > { %v2811_v6 = vpop.f32.mrb[24].mxu0 }
 0x19f   : > { %v1985_v7 = vpop.f32.mrb[25].mxu0  ;;  %v757_v1 = vmul.f32 (!%p1731_p5), %v2811_v6, %v2811_v6  ;;  %v756_v4 = vadd.f32 (!%p1731_p5), %v753_v0, %v2811_v6 }
 0x1a0   : > { %v2813_v8 = vpop.f32.mrb[26].mxu0 }
 0x1a1   : > { %v1986_v9 = vpop.f32.mrb[27].mxu0  ;;  %v760_v5 = vmul.f32 (!%p1731_p5), %v2813_v8, %v2813_v8  ;;  %v758_v7 = vadd.f32 (!%p1731_p5), %v757_v1, %v755_v3 }
 0x1a2   : > { %v759_v9 = vadd.f32 %v756_v4, %v2813_v8 }
 0x1a3   : > { %v761_v11 = vadd.f32 %v760_v5, %v758_v7 }
 0x1a4   : > { %v762_v12 = vadd.f32 %v759_v9, %v2767_v23 }
 0x1a5   : > { %v764_v14 = vadd.f32 %v763_v10, %v761_v11 }
 0x1a6   : > { %v765_v15 = vadd.f32 %v762_v12, %v2771_v27 }
 0x1a7   : > { %v767_v17 = vadd.f32 %v766_v13, %v764_v14 }
 0x1a8   : > { %v768_v18 = vadd.f32 %v765_v15, %v2775_v31 }
 0x1a9   : > { %v770_v20 = vadd.f32 %v769_v16, %v767_v17 }
 0x1aa   : > { %v771_v21 = vadd.f32 %v768_v18, %v2779_v35 }
 0x1ab   : > { %v773_v25 = vadd.f32 %v772_v19, %v770_v20 }
 0x1ac   : > { %v774_v28 = vadd.f32 %v771_v21, %v2783_v39 }
 0x1ad   : > { %v776_v32 = vadd.f32 %v775_v24, %v773_v25  ;;  %v823_v25 = vld [vmem:[%s3185_s2] sm:$0x1] }
 0x1ae   : > { %v777_v33 = vadd.f32 %v774_v28, %v2787_v43 }
 0x1af   : > { %v779_v37 = vadd.f32 %v778_v29, %v776_v32  ;;  %v828_v32 = vld [vmem:[%s3186_s3] sm:$0x1] }
 0x1b0   : > { %v780_v40 = vadd.f32 %v777_v33, %v2791_v47 }
 0x1b1   : > { %v782_v44 = vadd.f32 %v781_v36, %v779_v37 }
 0x1b2   : > { %v783_v45 = vadd.f32 %v780_v40, %v2795_v51 }
 0x1b3   : > { %v785_v49 = vadd.f32 %v784_v41, %v782_v44 }
 0x1b4   : > { %v786_v52 = vadd.f32 %v783_v45, %v2799_v55 }
 0x1b5   : > { %v788_v56 = vadd.f32 %v787_v48, %v785_v49 }
 0x1b6   : > { %v789_v57 = vadd.f32 %v786_v52, %v2803_v59 }
 0x1b7   : > { %v791_v61 = vadd.f32 %v790_v53, %v788_v56 }
 0x1b8   : > { %v792_v0 = vadd.f32 %v789_v57, %v2807_v63 }
 0x1b9   : > { %v794_v1 = vadd.f32 %v793_v60, %v791_v61 }
 0x1ba   : > { %v805_v3 = vrot.slane %v792_v0, 4 }
 0x1bb   : > { %v812_v5 = vrot.slane %v794_v1, 4 }
 0x1bc   : > { %v806_v4 = vadd.f32 %v805_v3, %v792_v0 }
 0x1bd   : > { %v813_v9 = vadd.f32 %v812_v5, %v794_v1 }
 0x1be   : > { %v807_v7 = vrot.slane %v806_v4, 2 }
 0x1bf   : > { %v814_v11 = vrot.slane %v813_v9, 2 }
 0x1c0   : > { %v808_v10 = vadd.f32 %v807_v7, %v806_v4 }
 0x1c1   : > { %v815_v13 = vadd.f32 %v814_v11, %v813_v9 }
 0x1c2   : > { %v809_v12 = vrot.slane %v808_v10, 1 }
 0x1c3   : > { %v816_v15 = vrot.slane %v815_v13, 1 }
 0x1c4   : > { %v810_v14 = vadd.f32 %v809_v12, %v808_v10 }
 0x1c5   : > { %v817_v16 = vadd.f32 %v816_v15, %v815_v13 }
 0x1c6   : > { %v818_v17 = vmul.f32 0.005, %v810_v14 }
 0x1c7   : > { %v819_v18 = vmul.f32 0.005, %v817_v16 }
 0x1c8   : > { %v820_v19 = vmul.f32 %v818_v17, %v818_v17 }
 0x1ca   : > { %v821_v20 = vsub.f32 %v819_v18, %v820_v19 }
 0x1cc   : > { %v822_v21 = vmax.f32 %v821_v20, 0.0 }
 0x1ce   : > { %v824_v24 = vadd.f32 1e-05, %v822_v21 }
 0x1d0   : > { %2281 = vrsqrt.f32 %v824_v24 }
 0x1da   : > { %v2282_v28 = vpop.eup %2281 }
 0x1db   : > { %v826_v29 = vmul.f32 %v2282_v28, %v823_v25 }
 0x1dd   : > { %827 = vst [vmem:[#allocation4] sm:$0x1] %v826_v29  ;;  %v829_v33 = vmul.f32 %v826_v29, %v818_v17 }
 0x1df   : > { %v830_v36 = vsub.f32 %v828_v32, %v829_v33 }
 0x1e1   : > { %831 = vst [vmem:[#allocation5] sm:$0x1] %v830_v36 }
 0x1e2 PF: > { %p1732_p3 = scmp.ne.s32.totalorder %s2497_s30, 1 }
 0x1e3   : > { %v2283_v37 = vld [vmem:[#allocation11] sm:$0xff] (!%p1732_p3)   ;;  %v2515_v40 = vmov (!%p1732_p3), 0.0   ;;  %v2284_v41 = vld [vmem:[#allocation11 + $0x8] sm:$0xff] (!%p1732_p3)   ;;  %vm2516_vm1 = vmmov (!%p1732_p3), 0   ;;  %v2285_v44 = vld [vmem:[#allocation11 + $0x10] sm:$0xff] (!%p1732_p3)  }
 0x1e4   : > { %835 = sbr.rel (%p1732_p3) target bundleno = 1045 (0x415), region = 84  ;;  %2011 = vmatprep.subr.bf16.mxu0 (!%p1732_p3), %v2515_v40  ;;  %2079 = vmatprep.subr.bf16.mxu1 (!%p1732_p3), %v2515_v40  ;;  %v2906_v45 = vld [vmem:[#allocation4] ss:$0 sm:$0xff] (!%p1732_p3)  ;;  %v2291_v48 = vld [vmem:[#allocation12] sm:$0xff] (!%p1732_p3)   ;;  %v2292_v56 = vld [vmem:[#allocation12 + $0x8] sm:$0xff] (!%p1732_p3)  }
 0x1e5   : > { %2012 = vmatpush3.bf16.msra.mxu0 (!%p1732_p3), %v2283_v37  ;;  %2027 = vmatprep.mubr.msk.bf16.mxu0 (!%p1732_p3), %vm2516_vm1, %v2515_v40  ;;  %v2286_v49 = vld [vmem:[#allocation11 + $0x18] sm:$0xff] (!%p1732_p3)   ;;  %v843_v52 = vmul.f32 (!%p1732_p3), %v2906_v45, %v2765_v22  ;;  %v844_v53 = vmul.f32 (!%p1732_p3), %v2906_v45, %v2769_v26  ;;  %v2287_v60 = vld [vmem:[#allocation11 + $0x20] sm:$0xff] (!%p1732_p3)   ;;  %v845_v22 = vmul.f32 (!%p1732_p3), %v2906_v45, %v2773_v30  ;;  %v2293_v1 = vld [vmem:[#allocation12 + $0x10] sm:$0xff] (!%p1732_p3)  }
 0x1e6   : > { %2013 = vmatprep.subr.bf16.mxu0 (!%p1732_p3), %v2515_v40  ;;  %2095 = vmatprep.mubr.msk.bf16.mxu1 (!%p1732_p3), %vm2516_vm1, %v2515_v40  ;;  %v2288_v26 = vld [vmem:[#allocation11 + $0x28] sm:$0xff] (!%p1732_p3)   ;;  %v846_v3 = vmul.f32 (!%p1732_p3), %v2906_v45, %v2777_v34  ;;  %v2294_v9 = vld [vmem:[#allocation12 + $0x18] sm:$0xff] (!%p1732_p3)   ;;  %v2289_v30 = vld [vmem:[#allocation11 + $0x30] sm:$0xff] (!%p1732_p3)   ;;  %v847_v11 = vmul.f32 (!%p1732_p3), %v2906_v45, %v2781_v38  ;;  %v848_v34 = vmul.f32 (!%p1732_p3), %v2906_v45, %v2785_v42 }
 0x1e7   : > { %2080 = vmatpush3.bf16.msra.mxu1 (!%p1732_p3), %v2291_v48  ;;  %v859_v12 = vmul.f32 (!%p1732_p3), %v2906_v45, %v2775_v31  ;;  %v2295_v16 = vld [vmem:[#allocation12 + $0x20] sm:$0xff] (!%p1732_p3)   ;;  %v860_v17 = vmul.f32 (!%p1732_p3), %v2906_v45, %v2779_v35  ;;  %v2290_v38 = vld [vmem:[#allocation11 + $0x38] sm:$0xff] (!%p1732_p3)   ;;  %v861_v31 = vmul.f32 (!%p1732_p3), %v2906_v45, %v2783_v39  ;;  %v862_v24 = vmul.f32 (!%p1732_p3), %v2906_v45, %v2787_v43  ;;  %v2296_v39 = vld [vmem:[#allocation12 + $0x28] sm:$0xff] (!%p1732_p3)  }
 0x1e8   : > { %v2913_v57 = vld [vmem:[#allocation5] ss:$0 sm:$0xff] (!%p1732_p3)  ;;  %2081 = vmatprep.subr.bf16.mxu1 (!%p1732_p3), %v2515_v40  ;;  %v863_v32 = vmul.f32 (!%p1732_p3), %v2906_v45, %v2791_v47  ;;  %v865_v47 = vmul.f32 (!%p1732_p3), %v2906_v45, %v2799_v55 }
 0x1e9   : > { %2014 = vmatpush3.bf16.msra.mxu0 (!%p1732_p3), %v2284_v41  ;;  %v875_v61 = vadd.f32 (!%p1732_p3), %v2913_v57, %v843_v52  ;;  %v876_v0 = vadd.f32 (!%p1732_p3), %v2913_v57, %v844_v53  ;;  %v2926_v7 = vadd.f32 (!%p1732_p3), %v2913_v57, %v845_v22  ;;  %v2930_v10 = vadd.f32 (!%p1732_p3), %v2913_v57, %v846_v3 }
 0x1ea   : > { %2015 = vmatprep.subr.bf16.mxu0 (!%p1732_p3), %v2515_v40  ;;  %v891_v18 = vadd.f32 (!%p1732_p3), %v2913_v57, %v859_v12  ;;  %v879_v19 = vadd.f32 (!%p1732_p3), %v2913_v57, %v847_v11  ;;  %v880_v20 = vadd.f32 (!%p1732_p3), %v2913_v57, %v848_v34  ;;  %v892_v21 = vadd.f32 (!%p1732_p3), %v2913_v57, %v860_v17 }
 0x1eb   : > { %2082 = vmatpush3.bf16.msra.mxu1 %v2292_v56  ;;  %v900_v4 = vmul.f32 0.01, %v875_v61  ;;  %v901_v5 = vmul.f32 0.01, %v876_v0  ;;  %v902_v15 = vmul.f32 0.01, %v2926_v7  ;;  %v893_v29 = vadd.f32 %v2913_v57, %v861_v31 }
 0x1ec   : > { %2083 = vmatprep.subr.bf16.mxu1 %v2515_v40  ;;  %v903_v42 = vmul.f32 0.01, %v2930_v10  ;;  %v916_v35 = vmul.f32 0.01, %v891_v18  ;;  %v917_v33 = vmul.f32 0.01, %v892_v21  ;;  %v894_v37 = vadd.f32 %v2913_v57, %v862_v24 }
 0x1ed   : > { %2016 = vmatpush3.bf16.msra.mxu0 %v2285_v44  ;;  %v925_v13 = vmax.f32 %v875_v61, %v900_v4  ;;  %v926_v14 = vmax.f32 %v876_v0, %v901_v5  ;;  %v927_v28 = vmax.f32 %v2926_v7, %v902_v15  ;;  %v864_v41 = vmul.f32 %v2906_v45, %v2795_v51 }
 0x1ee   : > { %2017 = vmatprep.subr.bf16.mxu0 %v2515_v40  ;;  %v941_v36 = vmax.f32 %v891_v18, %v916_v35  ;;  %v928_v43 = vmax.f32 %v2930_v10, %v903_v42  ;;  %v918_v44 = vmul.f32 0.01, %v893_v29  ;;  %v895_v48 = vadd.f32 %v2913_v57, %v863_v32 }
 0x1ef   : > { %2084 = vmatpush3.bf16.msra.mxu1 %v2293_v1  ;;  %v950_v25 = vpack.c.bf16 %v926_v14, %v925_v13  ;;  %v919_v52 = vmul.f32 0.01, %v894_v37  ;;  %v896_v53 = vadd.f32 %v2913_v57, %v864_v41  ;;  %v866_v56 = vmul.f32 %v2906_v45, %v2803_v59 }
 0x1f0   : > { %2085 = vmatprep.subr.bf16.mxu1 %v2515_v40  ;;  %v920_v51 = vmul.f32 0.01, %v895_v48  ;;  %v897_v61 = vadd.f32 %v2913_v57, %v865_v47  ;;  %v867_v0 = vmul.f32 %v2906_v45, %v2807_v63  ;;  %v850_v10 = vmul.f32 %v2906_v45, %v2793_v50 }
 0x1f1   : > { %2018 = vmatpush3.bf16.msra.mxu0 %v2286_v49  ;;  %v942_v49 = vmax.f32 %v892_v21, %v917_v33  ;;  %v944_v1 = vmax.f32 %v894_v37, %v919_v52  ;;  %v921_v55 = vmul.f32 0.01, %v896_v53  ;;  %v951_v34 = vpack.c.bf16 %v928_v43, %v927_v28 }
 0x1f2   : > { %2019 = vmatprep.subr.bf16.mxu0 %v2515_v40  ;;  %v945_v59 = vmax.f32 %v895_v48, %v920_v51  ;;  %v922_v3 = vmul.f32 0.01, %v897_v61  ;;  %v2978_v4 = vadd.f32 %v2913_v57, %v867_v0  ;;  %v905_v12 = vmul.f32 0.01, %v880_v20 }
 0x1f3   : > { %2086 = vmatpush3.bf16.msra.mxu1 %v2294_v9  ;;  %v2971_v22 = vpack.c.bf16 %v942_v49, %v941_v36  ;;  %v946_v63 = vmax.f32 %v896_v53, %v921_v55  ;;  %v904_v9 = vmul.f32 0.01, %v879_v19  ;;  %v852_v21 = vmul.f32 %v2906_v45, %v2801_v58 }
 0x1f4   : > { %2087 = vmatprep.subr.bf16.mxu1 %v2515_v40  ;;  %v947_v11 = vmax.f32 %v897_v61, %v922_v3  ;;  %v930_v17 = vmax.f32 %v880_v20, %v905_v12  ;;  %v854_v32 = vmul.f32 %v2906_v45, %v2809_v2  ;;  %v855_v37 = vmul.f32 %v2906_v45, %v2811_v6 }
 0x1f5   : > { %2020 = vmatpush3.bf16.msra.mxu0 %v2287_v60  ;;  %v943_v60 = vmax.f32 %v893_v29, %v918_v44  ;;  %v2986_v13 = vpack.c.bf16 %v946_v63, %v945_v59  ;;  %v884_v24 = vadd.f32 %v2913_v57, %v852_v21  ;;  %v856_v44 = vmul.f32 %v2906_v45, %v2813_v8  ;;  %v3048_v63 = vld [vmem:[%s3188_s5] ss:$0 sm:$0xff] }
 0x1f6   : > { %2021 = vmatprep.subr.bf16.mxu0 %v2515_v40  ;;  %v886_v36 = vadd.f32 %v2913_v57, %v854_v32  ;;  %v887_v47 = vadd.f32 %v2913_v57, %v855_v37  ;;  %v857_v52 = vmul.f32 %v2906_v45, %v2767_v23 }
 0x1f7   : > { %2088 = vmatpush3.bf16.msra.mxu1 %v2295_v16  ;;  %v2980_v5 = vpack.c.bf16 %v944_v1, %v943_v60  ;;  %v929_v16 = vmax.f32 %v879_v19, %v904_v9  ;;  %v909_v29 = vmul.f32 0.01, %v884_v24  ;;  %v888_v49 = vadd.f32 %v2913_v57, %v856_v44 }
 0x1f8   : > { %2089 = vmatprep.subr.bf16.mxu1 %v2515_v40  ;;  %v911_v43 = vmul.f32 0.01, %v886_v36  ;;  %v912_v53 = vmul.f32 0.01, %v887_v47  ;;  %v858_v60 = vmul.f32 %v2906_v45, %v2771_v27  ;;  %v889_v61 = vadd.f32 %v2913_v57, %v857_v52 }
 0x1f9   : > { %2022 = vmatpush3.bf16.msra.mxu0 %v2288_v26  ;;  %v898_v26 = vadd.f32 %v2913_v57, %v866_v56  ;;  %v952_v50 = vpack.c.bf16 %v930_v17, %v929_v16  ;;  %v913_v56 = vmul.f32 0.01, %v888_v49 }
 0x1fa   : > { %2023 = vmatprep.subr.bf16.mxu0 %v2515_v40  ;;  %v936_v48 = vmax.f32 %v886_v36, %v911_v43  ;;  %v937_v8 = vmax.f32 %v887_v47, %v912_v53  ;;  %v890_v0 = vadd.f32 %v2913_v57, %v858_v60  ;;  %v914_v55 = vmul.f32 0.01, %v889_v61 }
 0x1fb   : > { %2090 = vmatpush3.bf16.msra.mxu1 %v2296_v39  ;;  %v923_v7 = vmul.f32 0.01, %v898_v26  ;;  %v934_v39 = vmax.f32 %v884_v24, %v909_v29  ;;  %v938_v51 = vmax.f32 %v888_v49, %v913_v56 }
 0x1fc   : > { %2091 = vmatprep.subr.bf16.mxu1 %v2515_v40  ;;  %v939_v23 = vmax.f32 %v889_v61, %v914_v55 }
 0x1fd   : > { %2024 = vmatpush3.bf16.msra.mxu0 %v2289_v30  ;;  %v849_v30 = vmul.f32 %v2906_v45, %v2789_v46  ;;  %v948_v14 = vmax.f32 %v898_v26, %v923_v7  ;;  %v851_v46 = vmul.f32 %v2906_v45, %v2797_v54  ;;  %v956_v1 = vpack.c.bf16 %v938_v51, %v937_v8 }
 0x1fe   : > { %2025 = vmatprep.subr.bf16.mxu0 %v2515_v40  ;;  %v915_v26 = vmul.f32 0.01, %v890_v0 }
 0x1ff   : > { %v2988_v15 = vpack.c.bf16 %v948_v14, %v947_v11  ;;  %v881_v18 = vadd.f32 %v2913_v57, %v849_v30  ;;  %v883_v20 = vadd.f32 %v2913_v57, %v851_v46 }
 0x200   : > { %v940_v59 = vmax.f32 %v890_v0, %v915_v26 }
 0x201   : > { %2026 = vmatpush3.bf16.msra.mxu0 %v2290_v38  ;;  %v882_v38 = vadd.f32 %v2913_v57, %v850_v10  ;;  %v906_v42 = vmul.f32 0.01, %v881_v18  ;;  %v908_v28 = vmul.f32 0.01, %v883_v20 }
 0x202   : > { %v957_v27 = vpack.c.bf16 %v940_v59, %v939_v23 }
 0x203   : > { %v907_v31 = vmul.f32 0.01, %v882_v38  ;;  %v931_v35 = vmax.f32 %v881_v18, %v906_v42  ;;  %v933_v58 = vmax.f32 %v883_v20, %v908_v28 }
 0x204   : > { %2028 = vmatmul.mubr.bf16.vlgmr.msra.gmra.mrb[0].mxu0 %v950_v25  ;;  %v853_v25 = vmul.f32 %v2906_v45, %v2805_v62  ;;  %v2297_v45 = vld [vmem:[#allocation12 + $0x30] sm:$0xff]  }
 0x205   : > { %2031 = vmatprep.mubr.msk.bf16.mxu0 %vm2516_vm1, %v2515_v40  ;;  %v932_v19 = vmax.f32 %v882_v38, %v907_v31  ;;  %v954_v62 = vpack.c.bf16 %v934_v39, %v933_v58  ;;  %2092 = vmatpush3.bf16.msra.mxu1 %v2297_v45 }
 0x206   : > { %v885_v33 = vadd.f32 %v2913_v57, %v853_v25  ;;  %v924_v57 = vmul.f32 0.01, %v2978_v4  ;;  %2093 = vmatprep.subr.bf16.mxu1 %v2515_v40 }
 0x207   : > { %v953_v54 = vpack.c.bf16 %v932_v19, %v931_v35 }
 0x208   : > { %v910_v41 = vmul.f32 0.01, %v885_v33  ;;  %v949_v3 = vmax.f32 %v2978_v4, %v924_v57 }
 0x20a   : > { %v935_v2 = vmax.f32 %v885_v33, %v910_v41 }
 0x20c   : > { %2032 = vmatmul.mubr.bf16.gmra.mrb[4].mxu0 %v951_v34  ;;  %v955_v6 = vpack.c.bf16 %v936_v48, %v935_v2 }
 0x20d   : > { %2035 = vmatprep.mubr.msk.bf16.mxu0 %vm2516_vm1, %v2515_v40 }
 0x214   : > { %2036 = vmatmul.mubr.bf16.gmra.mrb[8].mxu0 %v952_v50 }
 0x215   : > { %2039 = vmatprep.mubr.msk.bf16.mxu0 %vm2516_vm1, %v2515_v40 }
 0x21c   : > { %2040 = vmatmul.mubr.bf16.gmra.mrb[12].mxu0 %v953_v54 }
 0x21d   : > { %2043 = vmatprep.mubr.msk.bf16.mxu0 %vm2516_vm1, %v2515_v40 }
 0x224   : > { %2044 = vmatmul.mubr.bf16.gmra.mrb[16].mxu0 %v954_v62 }
 0x225   : > { %2047 = vmatprep.mubr.msk.bf16.mxu0 %vm2516_vm1, %v2515_v40 }
 0x22c   : > { %2048 = vmatmul.mubr.bf16.gmra.mrb[20].mxu0 %v955_v6 }
 0x22d   : > { %2051 = vmatprep.mubr.msk.bf16.mxu0 %vm2516_vm1, %v2515_v40 }
 0x234   : > { %2052 = vmatmul.mubr.bf16.gmra.mrb[24].mxu0 %v956_v1 }
 0x235   : > { %2055 = vmatprep.mubr.msk.bf16.mxu0 %vm2516_vm1, %v2515_v40 }
 0x23c   : > { %2056 = vmatmul.mubr.bf16.gmra.mrb[28].mxu0 %v957_v27 }
 0x23d   : > { %2059 = vmatprep.mubr.msk.bf16.mxu0 %vm2516_vm1, %v2515_v40 }
 0x244   : > { %2060 = vmatmul.mubr.bf16.gmra.mrb[32].mxu0 %v2971_v22  ;;  %v2298_v22 = vld [vmem:[#allocation12 + $0x38] sm:$0xff]  }
 0x245   : > { %2063 = vmatprep.mubr.msk.bf16.mxu0 %vm2516_vm1, %v2515_v40  ;;  %2094 = vmatpush3.bf16.msra.mxu1 %v2298_v22 }
 0x24c   : > { %2064 = vmatmul.mubr.bf16.gmra.mrb[36].mxu0 %v2980_v5  ;;  %v962_v5 = vpack.c.bf16 %v949_v3, %v949_v3 }
 0x24d   : > { %2067 = vmatprep.mubr.msk.bf16.mxu0 %vm2516_vm1, %v2515_v40 }
 0x254   : > { %2068 = vmatmul.mubr.bf16.gmra.mrb[40].mxu0 %v2986_v13 }
 0x255   : > { %2071 = vmatprep.mubr.msk.bf16.mxu0 %vm2516_vm1, %v2515_v40 }
 0x25c   : > { %2072 = vmatmul.mubr.bf16.gmra.mrb[44].mxu0 %v2988_v15 }
 0x25d   : > { %2075 = vmatprep.mubr.msk.bf16.mxu0 %vm2516_vm1, %v2515_v40 }
 0x264   : > { %2076 = vmatmul.mubr.bf16.gmra.mrb[48].mxu0 %v962_v5 }
 0x2d7   : > { %v1068_v7 = vpop.f32.mrb[0].mxu0 }
 0x2d8   : > { %v2029_v9 = vpop.f32.mrb[1].mxu0  ;;  %v1069_v10 = vadd.f32 %v3048_v63, %v1068_v7 }
 0x2d9   : > { %v1071_v30 = vpop.f32.mrb[2].mxu0 }
 0x2da   : > { %v1072_v11 = vadd.f32 %v3048_v63, %v1071_v30  ;;  %v2030_v34 = vpop.f32.mrb[3].mxu0 }
 0x2dc   : > { %v1170_v12 = vpack.c.bf16 %v1072_v11, %v1069_v10 }
 0x2de   : > { %1813 = vst [vmem:[#allocation14] sm:$0xff] %v1170_v12   ;;  %2096 = vmatmul.mubr.bf16.vlgmr.msra.gmra.mrb[0].mxu1 %v1170_v12 }
 0x2df   : > { %v1076_v4 = vpop.f32.mrb[4].mxu0  ;;  %2099 = vmatprep.mubr.msk.bf16.mxu1 %vm2516_vm1, %v2515_v40 }
 0x2e0   : > { %v2033_v13 = vpop.f32.mrb[5].mxu0  ;;  %v1077_v15 = vadd.f32 %v3048_v63, %v1076_v4 }
 0x2e1   : > { %v1079_v14 = vpop.f32.mrb[6].mxu0 }
 0x2e2   : > { %v1080_v16 = vadd.f32 %v3048_v63, %v1079_v14  ;;  %v2034_v17 = vpop.f32.mrb[7].mxu0 }
 0x2e4   : > { %v1171_v18 = vpack.c.bf16 %v1080_v16, %v1077_v15 }
 0x2e6   : > { %1869 = vst [vmem:[#allocation14 + $0x8] sm:$0xff] %v1171_v18   ;;  %2100 = vmatmul.mubr.bf16.gmra.mrb[4].mxu1 %v1171_v18 }
 0x2e7   : > { %v1084_v38 = vpop.f32.mrb[8].mxu0  ;;  %2103 = vmatprep.mubr.msk.bf16.mxu1 %vm2516_vm1, %v2515_v40 }
 0x2e8   : > { %v2037_v46 = vpop.f32.mrb[9].mxu0  ;;  %v1085_v42 = vadd.f32 %v3048_v63, %v1084_v38 }
 0x2e9   : > { %v1087_v50 = vpop.f32.mrb[10].mxu0 }
 0x2ea   : > { %v1088_v31 = vadd.f32 %v3048_v63, %v1087_v50  ;;  %v2038_v21 = vpop.f32.mrb[11].mxu0 }
 0x2ec   : > { %v1172_v35 = vpack.c.bf16 %v1088_v31, %v1085_v42 }
 0x2ee   : > { %1870 = vst [vmem:[#allocation14 + $0x10] sm:$0xff] %v1172_v35   ;;  %2104 = vmatmul.mubr.bf16.gmra.mrb[8].mxu1 %v1172_v35 }
 0x2ef   : > { %v1092_v19 = vpop.f32.mrb[12].mxu0  ;;  %2107 = vmatprep.mubr.msk.bf16.mxu1 %vm2516_vm1, %v2515_v40 }
 0x2f0   : > { %v2041_v20 = vpop.f32.mrb[13].mxu0  ;;  %v1093_v25 = vadd.f32 %v3048_v63, %v1092_v19 }
 0x2f1   : > { %v1095_v24 = vpop.f32.mrb[14].mxu0 }
 0x2f2   : > { %v1096_v54 = vadd.f32 %v3048_v63, %v1095_v24  ;;  %v2042_v28 = vpop.f32.mrb[15].mxu0 }
 0x2f4   : > { %v1173_v29 = vpack.c.bf16 %v1096_v54, %v1093_v25 }
 0x2f6   : > { %1871 = vst [vmem:[#allocation14 + $0x18] sm:$0xff] %v1173_v29   ;;  %2108 = vmatmul.mubr.bf16.gmra.mrb[12].mxu1 %v1173_v29 }
 0x2f7   : > { %v1100_v32 = vpop.f32.mrb[16].mxu0  ;;  %2111 = vmatprep.mubr.msk.bf16.mxu1 %vm2516_vm1, %v2515_v40 }
 0x2f8   : > { %v2045_v58 = vpop.f32.mrb[17].mxu0  ;;  %v1101_v33 = vadd.f32 %v3048_v63, %v1100_v32  ;;  %v3102_v32 = vld [vmem:[%s3190_s7] ss:$0 sm:$0xff] }
 0x2f9   : > { %v1103_v39 = vpop.f32.mrb[18].mxu0 }
 0x2fa   : > { %v1104_v36 = vadd.f32 %v3048_v63, %v1103_v39  ;;  %v2046_v37 = vpop.f32.mrb[19].mxu0 }
 0x2fc   : > { %v1174_v62 = vpack.c.bf16 %v1104_v36, %v1101_v33 }
 0x2fe   : > { %1872 = vst [vmem:[#allocation14 + $0x20] sm:$0xff] %v1174_v62   ;;  %2112 = vmatmul.mubr.bf16.gmra.mrb[16].mxu1 %v1174_v62 }
 0x2ff   : > { %v1108_v41 = vpop.f32.mrb[20].mxu0  ;;  %2115 = vmatprep.mubr.msk.bf16.mxu1 %vm2516_vm1, %v2515_v40 }
 0x300   : > { %v2049_v43 = vpop.f32.mrb[21].mxu0  ;;  %v1109_v2 = vadd.f32 %v3048_v63, %v1108_v41 }
 0x301   : > { %v1111_v44 = vpop.f32.mrb[22].mxu0 }
 0x302   : > { %v1112_v48 = vadd.f32 %v3048_v63, %v1111_v44  ;;  %v2050_v47 = vpop.f32.mrb[23].mxu0 }
 0x304   : > { %v1175_v49 = vpack.c.bf16 %v1112_v48, %v1109_v2 }
 0x306   : > { %1873 = vst [vmem:[#allocation14 + $0x28] sm:$0xff] %v1175_v49   ;;  %2116 = vmatmul.mubr.bf16.gmra.mrb[20].mxu1 %v1175_v49 }
 0x307   : > { %v1116_v52 = vpop.f32.mrb[24].mxu0  ;;  %2119 = vmatprep.mubr.msk.bf16.mxu1 %vm2516_vm1, %v2515_v40 }
 0x308   : > { %v2053_v6 = vpop.f32.mrb[25].mxu0  ;;  %v1117_v56 = vadd.f32 %v3048_v63, %v1116_v52 }
 0x309   : > { %v1119_v53 = vpop.f32.mrb[26].mxu0 }
 0x30a   : > { %v1120_v60 = vadd.f32 %v3048_v63, %v1119_v53  ;;  %v2054_v8 = vpop.f32.mrb[27].mxu0 }
 0x30c   : > { %v1176_v51 = vpack.c.bf16 %v1120_v60, %v1117_v56 }
 0x30e   : > { %1874 = vst [vmem:[#allocation14 + $0x30] sm:$0xff] %v1176_v51   ;;  %2120 = vmatmul.mubr.bf16.gmra.mrb[24].mxu1 %v1176_v51 }
 0x30f   : > { %v1124_v61 = vpop.f32.mrb[28].mxu0  ;;  %2123 = vmatprep.mubr.msk.bf16.mxu1 %vm2516_vm1, %v2515_v40 }
 0x310   : > { %v2057_v0 = vpop.f32.mrb[29].mxu0  ;;  %v1125_v55 = vadd.f32 %v3048_v63, %v1124_v61 }
 0x311   : > { %v1127_v1 = vpop.f32.mrb[30].mxu0 }
 0x312   : > { %v1128_v26 = vadd.f32 %v3048_v63, %v1127_v1  ;;  %v2058_v23 = vpop.f32.mrb[31].mxu0 }
 0x314   : > { %v1177_v59 = vpack.c.bf16 %v1128_v26, %v1125_v55 }
 0x316   : > { %1875 = vst [vmem:[#allocation14 + $0x38] sm:$0xff] %v1177_v59   ;;  %2124 = vmatmul.mubr.bf16.gmra.mrb[28].mxu1 %v1177_v59 }
 0x317   : > { %v1132_v27 = vpop.f32.mrb[32].mxu0  ;;  %2127 = vmatprep.mubr.msk.bf16.mxu1 %vm2516_vm1, %v2515_v40 }
 0x318   : > { %v2061_v45 = vpop.f32.mrb[33].mxu0  ;;  %v1133_v22 = vadd.f32 %v3048_v63, %v1132_v27 }
 0x319   : > { %v1135_v57 = vpop.f32.mrb[34].mxu0 }
 0x31a   : > { %v1136_v3 = vadd.f32 %v3048_v63, %v1135_v57  ;;  %v2062_v5 = vpop.f32.mrb[35].mxu0 }
 0x31c   : > { %v1178_v7 = vpack.c.bf16 %v1136_v3, %v1133_v22 }
 0x31e   : > { %1876 = vst [vmem:[#allocation14 + $0x40] sm:$0xff] %v1178_v7   ;;  %2128 = vmatmul.mubr.bf16.gmra.mrb[32].mxu1 %v1178_v7 }
 0x31f   : > { %v1140_v9 = vpop.f32.mrb[36].mxu0  ;;  %2131 = vmatprep.mubr.msk.bf16.mxu1 %vm2516_vm1, %v2515_v40 }
 0x320   : > { %v2065_v30 = vpop.f32.mrb[37].mxu0  ;;  %v1141_v11 = vadd.f32 %v3048_v63, %v1140_v9 }
 0x321   : > { %v1143_v10 = vpop.f32.mrb[38].mxu0 }
 0x322   : > { %v1144_v34 = vadd.f32 %v3048_v63, %v1143_v10  ;;  %v2066_v12 = vpop.f32.mrb[39].mxu0 }
 0x324   : > { %v1179_v4 = vpack.c.bf16 %v1144_v34, %v1141_v11 }
 0x326   : > { %1877 = vst [vmem:[#allocation14 + $0x48] sm:$0xff] %v1179_v4   ;;  %2132 = vmatmul.mubr.bf16.gmra.mrb[36].mxu1 %v1179_v4 }
 0x327   : > { %v1148_v13 = vpop.f32.mrb[40].mxu0  ;;  %2135 = vmatprep.mubr.msk.bf16.mxu1 %vm2516_vm1, %v2515_v40 }
 0x328   : > { %v2069_v14 = vpop.f32.mrb[41].mxu0  ;;  %v1149_v16 = vadd.f32 %v3048_v63, %v1148_v13 }
 0x329   : > { %v1151_v15 = vpop.f32.mrb[42].mxu0 }
 0x32a   : > { %v1152_v17 = vadd.f32 %v3048_v63, %v1151_v15  ;;  %v2070_v18 = vpop.f32.mrb[43].mxu0 }
 0x32c   : > { %v1180_v38 = vpack.c.bf16 %v1152_v17, %v1149_v16 }
 0x32e   : > { %1878 = vst [vmem:[#allocation14 + $0x50] sm:$0xff] %v1180_v38   ;;  %2136 = vmatmul.mubr.bf16.gmra.mrb[40].mxu1 %v1180_v38 }
 0x32f   : > { %v1156_v46 = vpop.f32.mrb[44].mxu0  ;;  %2139 = vmatprep.mubr.msk.bf16.mxu1 %vm2516_vm1, %v2515_v40 }
 0x330   : > { %v2073_v50 = vpop.f32.mrb[45].mxu0  ;;  %v1157_v31 = vadd.f32 %v3048_v63, %v1156_v46 }
 0x331   : > { %v1159_v42 = vpop.f32.mrb[46].mxu0 }
 0x332   : > { %v1160_v21 = vadd.f32 %v3048_v63, %v1159_v42  ;;  %v2074_v35 = vpop.f32.mrb[47].mxu0 }
 0x334   : > { %v1181_v19 = vpack.c.bf16 %v1160_v21, %v1157_v31 }
 0x336   : > { %1879 = vst [vmem:[#allocation14 + $0x58] sm:$0xff] %v1181_v19   ;;  %2140 = vmatmul.mubr.bf16.gmra.mrb[44].mxu1 %v1181_v19 }
 0x337   : > { %v1164_v20 = vpop.f32.mrb[48].mxu0  ;;  %2143 = vmatprep.mubr.msk.bf16.mxu1 %vm2516_vm1, %v2515_v40 }
 0x338   : > { %v1165_v24 = vadd.f32 %v3048_v63, %v1164_v20  ;;  %v2077_v25 = vpop.f32.mrb[49].mxu0 }
 0x339   : > { %v1167_v54 = vpop.f32.mrb[50].mxu0 }
 0x33a   : > { %v1182_v28 = vpack.c.bf16 %v1165_v24, %v1165_v24  ;;  %v2078_v29 = vpop.f32.mrb[51].mxu0 }
 0x33c   : > { %1295 = vst [vmem:[#allocation14 + $0x60] sm:$0xf] %v1182_v28 }
 0x33e   : > { %2144 = vmatmul.mubr.bf16.gmra.mrb[48].mxu1 %v1182_v28 }
 0x3b1   : > { %v1401_v58 = vpop.f32.mrb[0].mxu1 }
 0x3b2   : > { %v1402_v39 = vadd.f32 %v3102_v32, %v1401_v58  ;;  %v2097_v33 = vpop.f32.mrb[1].mxu1 }
 0x3b3   : > { %v1404_v36 = vpop.f32.mrb[2].mxu1 }
 0x3b4   : > { %1503 = vst [vmem:[#allocation15] sm:$0xff] %v1402_v39  ;;  %v1405_v40 = vadd.f32 %v3102_v32, %v1404_v36  ;;  %v2098_v63 = vpop.f32.mrb[3].mxu1 }
 0x3b6   : > { %1504 = vst [vmem:[#allocation15 + $0x8] sm:$0xff] %v1405_v40 }
 0x3b9   : > { %v1409_v37 = vpop.f32.mrb[4].mxu1 }
 0x3ba   : > { %v1410_v62 = vadd.f32 %v3102_v32, %v1409_v37  ;;  %v2101_v41 = vpop.f32.mrb[5].mxu1 }
 0x3bb   : > { %v1412_v43 = vpop.f32.mrb[6].mxu1 }
 0x3bc   : > { %1505 = vst [vmem:[#allocation15 + $0x10] sm:$0xff] %v1410_v62  ;;  %v1413_v44 = vadd.f32 %v3102_v32, %v1412_v43  ;;  %v2102_v2 = vpop.f32.mrb[7].mxu1 }
 0x3be   : > { %1506 = vst [vmem:[#allocation15 + $0x18] sm:$0xff] %v1413_v44 }
 0x3c1   : > { %v1417_v48 = vpop.f32.mrb[8].mxu1 }
 0x3c2   : > { %v1418_v47 = vadd.f32 %v3102_v32, %v1417_v48  ;;  %v2105_v49 = vpop.f32.mrb[9].mxu1 }
 0x3c3   : > { %v1420_v52 = vpop.f32.mrb[10].mxu1 }
 0x3c4   : > { %1507 = vst [vmem:[#allocation15 + $0x20] sm:$0xff] %v1418_v47  ;;  %v1421_v6 = vadd.f32 %v3102_v32, %v1420_v52  ;;  %v2106_v53 = vpop.f32.mrb[11].mxu1 }
 0x3c6   : > { %1508 = vst [vmem:[#allocation15 + $0x28] sm:$0xff] %v1421_v6 }
 0x3c9   : > { %v1425_v56 = vpop.f32.mrb[12].mxu1 }
 0x3ca   : > { %v1426_v60 = vadd.f32 %v3102_v32, %v1425_v56  ;;  %v2109_v8 = vpop.f32.mrb[13].mxu1 }
 0x3cb   : > { %v1428_v51 = vpop.f32.mrb[14].mxu1 }
 0x3cc   : > { %1509 = vst [vmem:[#allocation15 + $0x30] sm:$0xff] %v1426_v60  ;;  %v1429_v61 = vadd.f32 %v3102_v32, %v1428_v51  ;;  %v2110_v0 = vpop.f32.mrb[15].mxu1 }
 0x3ce   : > { %1510 = vst [vmem:[#allocation15 + $0x38] sm:$0xff] %v1429_v61 }
 0x3d1   : > { %v1433_v1 = vpop.f32.mrb[16].mxu1 }
 0x3d2   : > { %v1434_v55 = vadd.f32 %v3102_v32, %v1433_v1  ;;  %v2113_v26 = vpop.f32.mrb[17].mxu1 }
 0x3d3   : > { %v1436_v23 = vpop.f32.mrb[18].mxu1 }
 0x3d4   : > { %1511 = vst [vmem:[#allocation15 + $0x40] sm:$0xff] %v1434_v55  ;;  %v1437_v59 = vadd.f32 %v3102_v32, %v1436_v23  ;;  %v2114_v27 = vpop.f32.mrb[19].mxu1 }
 0x3d6   : > { %1512 = vst [vmem:[#allocation15 + $0x48] sm:$0xff] %v1437_v59 }
 0x3d9   : > { %v1441_v45 = vpop.f32.mrb[20].mxu1 }
 0x3da   : > { %v1442_v57 = vadd.f32 %v3102_v32, %v1441_v45  ;;  %v2117_v22 = vpop.f32.mrb[21].mxu1 }
 0x3db   : > { %v1444_v3 = vpop.f32.mrb[22].mxu1 }
 0x3dc   : > { %1513 = vst [vmem:[#allocation15 + $0x50] sm:$0xff] %v1442_v57  ;;  %v1445_v5 = vadd.f32 %v3102_v32, %v1444_v3  ;;  %v2118_v7 = vpop.f32.mrb[23].mxu1 }
 0x3de   : > { %1514 = vst [vmem:[#allocation15 + $0x58] sm:$0xff] %v1445_v5 }
 0x3e1   : > { %v1449_v9 = vpop.f32.mrb[24].mxu1 }
 0x3e2   : > { %v1450_v30 = vadd.f32 %v3102_v32, %v1449_v9  ;;  %v2121_v10 = vpop.f32.mrb[25].mxu1 }
 0x3e3   : > { %v1452_v11 = vpop.f32.mrb[26].mxu1 }
 0x3e4   : > { %1515 = vst [vmem:[#allocation15 + $0x60] sm:$0xff] %v1450_v30  ;;  %v1453_v34 = vadd.f32 %v3102_v32, %v1452_v11  ;;  %v2122_v12 = vpop.f32.mrb[27].mxu1 }
 0x3e6   : > { %1516 = vst [vmem:[#allocation15 + $0x68] sm:$0xff] %v1453_v34 }
 0x3e9   : > { %v1457_v4 = vpop.f32.mrb[28].mxu1 }
 0x3ea   : > { %v1458_v13 = vadd.f32 %v3102_v32, %v1457_v4  ;;  %v2125_v14 = vpop.f32.mrb[29].mxu1 }
 0x3eb   : > { %v1460_v15 = vpop.f32.mrb[30].mxu1 }
 0x3ec   : > { %1517 = vst [vmem:[#allocation15 + $0x70] sm:$0xff] %v1458_v13  ;;  %v1461_v16 = vadd.f32 %v3102_v32, %v1460_v15  ;;  %v2126_v17 = vpop.f32.mrb[31].mxu1 }
 0x3ee   : > { %1518 = vst [vmem:[#allocation15 + $0x78] sm:$0xff] %v1461_v16 }
 0x3f1   : > { %v1465_v18 = vpop.f32.mrb[32].mxu1 }
 0x3f2   : > { %v1466_v38 = vadd.f32 %v3102_v32, %v1465_v18  ;;  %v2129_v46 = vpop.f32.mrb[33].mxu1 }
 0x3f3   : > { %v1468_v50 = vpop.f32.mrb[34].mxu1 }
 0x3f4   : > { %1519 = vst [vmem:[#allocation15 + $0x80] sm:$0xff] %v1466_v38  ;;  %v1469_v42 = vadd.f32 %v3102_v32, %v1468_v50  ;;  %v2130_v31 = vpop.f32.mrb[35].mxu1 }
 0x3f6   : > { %1520 = vst [vmem:[#allocation15 + $0x88] sm:$0xff] %v1469_v42 }
 0x3f9   : > { %v1473_v21 = vpop.f32.mrb[36].mxu1 }
 0x3fa   : > { %v1474_v35 = vadd.f32 %v3102_v32, %v1473_v21  ;;  %v2133_v19 = vpop.f32.mrb[37].mxu1 }
 0x3fb   : > { %v1476_v20 = vpop.f32.mrb[38].mxu1 }
 0x3fc   : > { %1521 = vst [vmem:[#allocation15 + $0x90] sm:$0xff] %v1474_v35  ;;  %v1477_v24 = vadd.f32 %v3102_v32, %v1476_v20  ;;  %v2134_v25 = vpop.f32.mrb[39].mxu1 }
 0x3fe   : > { %1522 = vst [vmem:[#allocation15 + $0x98] sm:$0xff] %v1477_v24 }
 0x401   : > { %v1481_v54 = vpop.f32.mrb[40].mxu1 }
 0x402   : > { %v1482_v28 = vadd.f32 %v3102_v32, %v1481_v54  ;;  %v2137_v29 = vpop.f32.mrb[41].mxu1 }
 0x403   : > { %v1484_v58 = vpop.f32.mrb[42].mxu1 }
 0x404   : > { %1523 = vst [vmem:[#allocation15 + $0xa0] sm:$0xff] %v1482_v28  ;;  %v1485_v39 = vadd.f32 %v3102_v32, %v1484_v58  ;;  %v2138_v33 = vpop.f32.mrb[43].mxu1 }
 0x406   : > { %1524 = vst [vmem:[#allocation15 + $0xa8] sm:$0xff] %v1485_v39 }
 0x409   : > { %v1489_v36 = vpop.f32.mrb[44].mxu1 }
 0x40a   : > { %v1490_v40 = vadd.f32 %v3102_v32, %v1489_v36  ;;  %v2141_v63 = vpop.f32.mrb[45].mxu1 }
 0x40b   : > { %v1492_v37 = vpop.f32.mrb[46].mxu1 }
 0x40c   : > { %1525 = vst [vmem:[#allocation15 + $0xb0] sm:$0xff] %v1490_v40  ;;  %v1493_v62 = vadd.f32 %v3102_v32, %v1492_v37  ;;  %v2142_v41 = vpop.f32.mrb[47].mxu1 }
 0x40e   : > { %1526 = vst [vmem:[#allocation15 + $0xb8] sm:$0xff] %v1493_v62 }
 0x411   : > { %v1497_v43 = vpop.f32.mrb[48].mxu1 }
 0x412   : > { %v1498_v44 = vadd.f32 %v3102_v32, %v1497_v43  ;;  %v2145_v2 = vpop.f32.mrb[49].mxu1 }
 0x413   : > { %v1500_v48 = vpop.f32.mrb[50].mxu1 }
 0x414   : > { %1527 = vst [vmem:[#allocation15 + $0xc0] sm:$0xff] %v1498_v44  ;;  %v2146_v47 = vpop.f32.mrb[51].mxu1 }
 0x415 PF: > { %s3209_s9 = sadd.s32 4294967295, %s2505_s11   ;;  %s2517_s12 = smov [#allocation14]  }
 0x416   : > { %p3131_p6 = scmp.eq.s32.totalorder %s3209_s9, 1  ;;  %s1548_s13 = sshll.u32 %s2517_s12, 4  ;;  %s1549_s13 = int_to_ptr.vmem [resolvable:$true] %s1548_s13 }
 0x417   : > { %s2411_s23 = scalar_lea.vmem %s1549_s13, 1600  ;;  %s2417_s24 = scalar_lea.vmem %s1549_s13, 3200 }
 0x418   : > { %p2412_p9 = scmp.ne.s32.totalorder %s1549_s13, %s2411_s23  ;;  %p2418_p12 = scmp.lt.s32.totalorder %s1549_s13, %s1549_s13 }
 0x419   : > { %p2419_p13 = scmp.lt.s32.totalorder %s2417_s24, %s2411_s23 }
 0x41a   : > { %p2413_p10 = pnand %p2412_p9, %p3131_p6 }
 0x41b   : > { %p2420_p0 = por %p2419_p13, %p2418_p12 }
 0x41c   : > { %p2414_p11 = pneg %p2413_p10 }
 0x41e   : > { %p2421_p1 = pnand %p2420_p0, %p2414_p11 }
 0x420   : > { %2424 = shalt.err (!%p2421_p1)
}
 0x421   : > { %s2425_s17 = scalar_lea.hbm %s3191_s8, 1600 }
 0x422   : > { %p2426_p4 = scmp.ne.s32.totalorder %s3191_s8, %s2425_s17  ;;  %p2431_p8 = scmp.lt.u32.totalorder %s2425_s17, %s3191_s8 }
 0x424   : > { %p2427_p7 = pnand %p2426_p4, %p3131_p6 }
 0x426   : > { %p2428_p2 = pneg %p2427_p7 }
 0x428   : > { %p2433_p5 = pnand %p2431_p8, %p2428_p2 }
 0x42a   : > { %2436 = shalt.err (!%p2433_p5)
}
 0x42b   : > { %s2518_s15 = smov 64   ;;  %s2519_s18 = smov 4  }
 0x42c   : > { %2180 = dma.vmem_to_hbm [thread:$0]  (%p3131_p6), %s1549_s13, 1600, %s3191_s8, [#allocation8], %s2518_s15, %s2518_s15, %s2519_s18  }
 0x42d   : > { %s2520_s16 = smov [#allocation15]  }
 0x42e   : > { %s1565_s21 = sshll.u32 %s2520_s16, 4  ;;  %s1566_s21 = int_to_ptr.vmem [resolvable:$true] %s1565_s21 }
 0x42f   : > { %s2437_s22 = scalar_lea.vmem %s1566_s21, 3200  ;;  %s2443_s9 = scalar_lea.vmem %s1566_s21, 6400 }
 0x430   : > { %p2438_p3 = scmp.ne.s32.totalorder %s1566_s21, %s2437_s22  ;;  %p2444_p11 = scmp.lt.s32.totalorder %s1566_s21, %s1566_s21 }
 0x431   : > { %p2445_p12 = scmp.lt.s32.totalorder %s2443_s9, %s2437_s22 }
 0x432   : > { %p2439_p9 = pnand %p2438_p3, %p3131_p6 }
 0x433   : > { %p2446_p13 = por %p2445_p12, %p2444_p11 }
 0x434   : > { %p2440_p10 = pneg %p2439_p9 }
 0x436   : > { %p2447_p0 = pnand %p2446_p13, %p2440_p10 }
 0x438   : > { %2450 = shalt.err (!%p2447_p0)
}
 0x439   : > { %s3211_s24 = sld [smem:[#allocation23_spill]] }
 0x43f   : > { %s2451_s27 = scalar_lea.hbm %s3211_s24, 3200 }
 0x440   : > { %p2452_p1 = scmp.ne.s32.totalorder %s3211_s24, %s2451_s27  ;;  %p2457_p2 = scmp.lt.u32.totalorder %s2451_s27, %s3211_s24 }
 0x442   : > { %p2453_p4 = pnand %p2452_p1, %p3131_p6 }
 0x444   : > { %p2454_p7 = pneg %p2453_p4 }
 0x446   : > { %p2459_p8 = pnand %p2457_p2, %p2454_p7 }
 0x448   : > { %2462 = shalt.err (!%p2459_p8)
}
 0x449   : > { %s2521_s20 = smov 128   ;;  %s2522_s25 = smov 8  }
 0x44a   : > { %2182 = dma.vmem_to_hbm [thread:$0]  (%p3131_p6), %s1566_s21, 3200, %s3211_s24, [#allocation16], %s2521_s20, %s2521_s20, %s2522_s25  }
 0x44b PF: > { %p2217_p5 = scmp.ge.s32.totalorder %s2505_s11, 2  ;;  %s3212_s18 = sadd.s32 4294967294, %s2505_s11  }
 0x44c   : > { %p2218_p3 = scmp.eq.s32.totalorder %s3212_s18, 1 }
 0x44e   : > { %p2201_p9 = pnand %p2218_p3, %p2217_p5 }
 0x450   : > { %2488 = dma.done.wait (!%p2201_p9), [#allocation8], 1600  }
 0x451   : > { %2490 = vsyncadd (!%p2201_p9), [#allocation8], 4294965696 }
 0x452   : > { %2492 = dma.done.wait (!%p2201_p9), [#allocation16], 3200  }
 0x453   : > { %2494 = vsyncadd (!%p2201_p9), [#allocation16], 4294964096  ;;  %s29_s11 = sadd.s32 1, %s2505_s11   ;;  %s3213_s30 = sld [smem:[#allocation22_spill]] }
 0x454   : > { %p26_p10 = scmp.ge.s32.totalorder %s29_s11, 4   ;;  %s3214_s10 = smov %s3216_s19 }
 0x456   :  { %28 = sbr.rel (!%p26_p10) target bundleno = 10 (0xa), region = 135 }
 0x45d   :  { %1595 = vsyncpa [#allocation7], 1 }
 0x45e   :  { %1597 = vsyncpa [#allocation7 + $0x1], 1 }
 0x45f   :  { %1598 = vsyncpa [#allocation10], 1 }
 0x460   :  { %1599 = vsyncpa [#allocation13], 1 }
 0x461   :  { %1600 = vsyncpa [#allocation8], 1 }
 0x462   :  { %1602 = vsyncpa [#allocation8 + $0x1], 1 }
 0x463   :  { %1603 = vsyncpa [#allocation16], 1 }
 0x464   :  { %1605 = vsyncpa [#allocation16 + $0x1], 1 }

</bundles_post_ra>
